<compile_context>
chip_gen: v5e
topology: v5e:2x2
jax: 0.10.0
libtpu: 0.0.40
codegen_flags: <defaults>
</compile_context>

<pallas_src>
import numpy as np
import jax
import jax.numpy as jnp
from jax.experimental import pallas as pl
from jax.experimental.pallas import tpu as pltpu

S_ACT = 0.0  # shift
R_ACT = 1.0  # reduce
PAD1 = 0
PAD2 = 2


def _vmem():
    return pl.BlockSpec(memory_space=pltpu.MemorySpace.VMEM)


# ---------------------------------------------------------------------------
# Pallas kernel: bidirectional q_leaf LSTM (one call, both directions)
# ---------------------------------------------------------------------------
def _bilstm_kernel(xp_ref, wh_ref, out_ref, h_sc, c_sc):
    """One grid step = one direction.  The T-step recurrence runs fully
    in-kernel (statically unrolled), so there is no per-timestep grid overhead.

    xp_ref : [T, B, 4H]  precomputed x@Wx + b (already time-reversed for the
                         backward direction, so the kernel always walks forward)
    wh_ref : [H, 4H]     recurrent weight of this direction (VMEM resident)
    Gate order (i, f, o, g).
    """
    h_sc[...] = jnp.zeros_like(h_sc)
    c_sc[...] = jnp.zeros_like(c_sc)
    T = xp_ref.shape[0]
    H = h_sc.shape[1]
    wh = wh_ref[...]
    # TODO(synk): for long sequences (T >> 64) switch to lax.fori_loop with a
    # pl.ds dynamic time index to bound compile time.
    for t in range(T):
        gates = xp_ref[t, :, :] + jnp.dot(h_sc[...], wh,
                                          preferred_element_type=jnp.float32)
        i = gates[:, 0 * H:1 * H]
        f = gates[:, 1 * H:2 * H]
        o = gates[:, 2 * H:3 * H]
        g = gates[:, 3 * H:4 * H]
        c_new = jax.nn.sigmoid(f) * c_sc[...] + jax.nn.sigmoid(i) * jnp.tanh(g)
        h_new = jax.nn.sigmoid(o) * jnp.tanh(c_new)
        h_sc[...] = h_new
        c_sc[...] = c_new
        out_ref[t, :, :] = h_new


def bilstm(xp2, wh2):
    """xp2: [2, T, B, 4H] (dir 1 time-reversed), wh2: [2, H, 4H] -> [2, T, B, H]."""
    _, T, B, G = xp2.shape
    H = G // 4
    return pl.pallas_call(
        _bilstm_kernel,
        out_shape=jax.ShapeDtypeStruct((2, T, B, H), jnp.float32),
        grid=(2,),
        in_specs=[pl.BlockSpec((None, T, B, G), lambda d: (d, 0, 0, 0)),
                  pl.BlockSpec((None, H, G), lambda d: (d, 0, 0))],
        out_specs=pl.BlockSpec((None, T, B, H), lambda d: (d, 0, 0, 0)),
        scratch_shapes=[pltpu.VMEM((B, H), jnp.float32),
                        pltpu.VMEM((B, H), jnp.float32)],
        compiler_params=pltpu.CompilerParams(
            dimension_semantics=("parallel",)),   # one direction per core on v7x
    )(xp2, wh2)


# ---------------------------------------------------------------------------
# Pallas kernel: fused q_binary span scorer (lane-dense [B, n, n] output)
# ---------------------------------------------------------------------------
def _span_score_kernel(pj_ref, qi_ref, b1_ref, g_ref, beta_ref, w2_ref, b2_ref,
                       out_ref):
    """The first Linear of q_binary is affine, so
    Linear(cat(fwd_diff, bwd_diff)) = Qi[i] + Pj[j] + b1, with Pj/Qi precomputed
    as O(n*q) batched matmuls.  ReLU -> LayerNorm(eps=1e-5) -> Linear(., 1)
    runs here; the O(n^2) hidden never leaves VMEM and the output is already in
    the [B, n, n] layout the CRF needs (no downstream transpose, no trailing-1
    masked stores)."""
    pj = pj_ref[...]                                   # [B, n, 2q]   (index j)
    qi = qi_ref[...]                                   # [B, n, 2q]   (index i)
    h = qi[:, :, None, :] + pj[:, None, :, :] + b1_ref[...]   # [B, n, n, 2q]
    h = jnp.maximum(h, 0.0)
    mu = jnp.mean(h, axis=-1, keepdims=True)
    var = jnp.mean(jnp.square(h - mu), axis=-1, keepdims=True)
    hn = (h - mu) * jax.lax.rsqrt(var + 1e-5)
    hn = hn * g_ref[...] + beta_ref[...]
    out_ref[...] = jnp.sum(hn * w2_ref[...], axis=-1) + b2_ref[...]


def span_scores_call(params, pj, qi):
    # TODO(synk): for long sentences tile the i axis with a grid and raise
    # vmem_limit_bytes (v7x: 64 MiB physical, v5e: 16 MiB default scoped); a
    # single block is right at these sizes.
    B, n, _ = pj.shape
    return pl.pallas_call(
        _span_score_kernel,
        out_shape=jax.ShapeDtypeStruct((B, n, n), jnp.float32),
        in_specs=[_vmem()] * 7,
        out_specs=_vmem(),
    )(pj, qi, params['qb_b1'], params['qb_gamma'], params['qb_beta'],
      params['qb_w2'], params['qb_b2'])


# ---------------------------------------------------------------------------
# Pallas kernel: fused shift/reduce action loop (grid over actions)
# ---------------------------------------------------------------------------
def action_loop_call(params, pk, wv_steps, init_emb, max_dc, max_d2):
    """One pallas_call for the whole generative action loop.

    pk       : [A, BE, Km] host-built per-step control slab
               [red(1) | c1_mask(max_dc) | c2_mask(max_dc) | cpush_mask(max_dc)
                | sprev_mask(max_d2) | spush_mask(max_d2)]
    wv_steps : [A, BE, W]  word vector to shift at each step (ignored on reduce)
    init_emb : [BE, W]     embedding of the start symbol
    Returns contexts [A, BE, H]: the stack-RNN top (last layer h) BEFORE each
    action, exactly as the PyTorch reference records them.
    """
    A, BE, Km = pk.shape
    W = wv_steps.shape[2]
    H = params['h_dim']
    L = params['num_layers']
    assert Km == 1 + 3 * max_dc + 2 * max_d2

    swx = jnp.stack(params['stack_wx'], axis=0)    # [L, W, 4H]  (w_dim == h_dim)
    swh = jnp.stack(params['stack_wh'], axis=0)    # [L, H, 4H]
    sb = jnp.stack(params['stack_b'], axis=0)      # [L, 1, 4H]

    o_c1 = 1
    o_c2 = o_c1 + max_dc
    o_cp = o_c2 + max_dc
    o_sp = o_cp + max_dc
    o_ss = o_sp + max_d2

    def kernel(pk_ref, wv_ref, init_ref, tw1_ref, tw2_ref, tb_ref,
               swx_ref, swh_ref, sb_ref, ctx_ref, *scr):
        ch_h, ch_c = scr[0], scr[1]
        stk_h = scr[2:2 + L]
        stk_c = scr[2 + L:2 + 2 * L]
        top_h = scr[2 + 2 * L]

        swx_all = swx_ref[...]
        swh_all = swh_ref[...]
        sb_all = sb_ref[...]

        def seq_cell(l, inp, ph, pc):
            gates = (jnp.dot(inp, swx_all[l], preferred_element_type=jnp.float32)
                     + jnp.dot(ph, swh_all[l], preferred_element_type=jnp.float32)
                     + sb_all[l])
            i = gates[:, 0 * H:1 * H]
            f = gates[:, 1 * H:2 * H]
            o = gates[:, 2 * H:3 * H]
            g = gates[:, 3 * H:4 * H]
            c_new = jax.nn.sigmoid(f) * pc + jax.nn.sigmoid(i) * jnp.tanh(g)
            h_new = jax.nn.sigmoid(o) * jnp.tanh(c_new)
            return h_new, c_new

        @pl.when(pl.program_id(0) == 0)
        def _init():
            ch_h[...] = jnp.zeros_like(ch_h)
            ch_c[...] = jnp.zeros_like(ch_c)
            for l in range(L):
                stk_h[l][...] = jnp.zeros_like(stk_h[l])
                stk_c[l][...] = jnp.zeros_like(stk_c[l])
            inp = init_ref[...]
            zero = jnp.zeros((inp.shape[0], H), jnp.float32)
            for l in range(L):
                h0, c0 = seq_cell(l, inp, zero, zero)
                stk_h[l][:, 0:1, :] = h0[:, None, :]
                stk_c[l][:, 0:1, :] = c0[:, None, :]
                inp = h0
            top_h[...] = inp

        # context BEFORE this action = current top of the stack RNN
        ctx_ref[0, :, :] = top_h[...]

        pkv = pk_ref[0, :, :]                                   # [BE, Km]
        red = pkv[:, 0:1]                                       # [BE, 1]
        c1m = pkv[:, o_c1:o_c1 + max_dc][:, :, None]            # [BE, max_dc, 1]
        c2m = pkv[:, o_c2:o_c2 + max_dc][:, :, None]
        cpm = pkv[:, o_cp:o_cp + max_dc][:, :, None]
        spm = pkv[:, o_sp:o_sp + max_d2][:, :, None]            # [BE, max_d2, 1]
        ssm = pkv[:, o_ss:o_ss + max_d2][:, :, None]

        chh, chc = ch_h[...], ch_c[...]
        c1h = jnp.sum(chh * c1m, axis=1)                        # top constituent
        c1c = jnp.sum(chc * c1m, axis=1)
        c2h = jnp.sum(chh * c2m, axis=1)                        # second constituent
        c2c = jnp.sum(chc * c2m, axis=1)

        # TreeLSTM composition, gates (i, f1, f2, o, g); shift rows masked below
        tg = (jnp.dot(c1h, tw1_ref[...], preferred_element_type=jnp.float32)
              + jnp.dot(c2h, tw2_ref[...], preferred_element_type=jnp.float32)
              + tb_ref[...])
        D = c1h.shape[1]
        ti = tg[:, 0 * D:1 * D]
        tf1 = tg[:, 1 * D:2 * D]
        tf2 = tg[:, 2 * D:3 * D]
        to = tg[:, 3 * D:4 * D]
        tgg = tg[:, 4 * D:5 * D]
        t_c = (jax.nn.sigmoid(tf1) * c1c + jax.nn.sigmoid(tf2) * c2c
               + jax.nn.sigmoid(ti) * jnp.tanh(tgg))
        t_h = jax.nn.sigmoid(to) * jnp.tanh(t_c)

        stack_input = red * t_h + (1.0 - red) * wv_ref[0, :, :]
        push_c = red * t_c

        # push onto the constituent stack (shift pushes (word_vec, 0))
        ch_h[...] = chh * (1.0 - cpm) + cpm * stack_input[:, None, :]
        ch_c[...] = chc * (1.0 - cpm) + cpm * push_c[:, None, :]

        # stack-RNN step from the (post-pop) previous state, then push
        inp = stack_input
        for l in range(L):
            sh = stk_h[l][...]
            sc_ = stk_c[l][...]
            ph = jnp.sum(sh * spm, axis=1)
            pc = jnp.sum(sc_ * spm, axis=1)
            h_new, c_new = seq_cell(l, inp, ph, pc)
            stk_h[l][...] = sh * (1.0 - ssm) + ssm * h_new[:, None, :]
            stk_c[l][...] = sc_ * (1.0 - ssm) + ssm * c_new[:, None, :]
            inp = h_new
        top_h[...] = inp

    scratch = ([pltpu.VMEM((BE, max_dc, W), jnp.float32)] * 2
               + [pltpu.VMEM((BE, max_d2, H), jnp.float32)] * (2 * L)
               + [pltpu.VMEM((BE, H), jnp.float32)])

    return pl.pallas_call(
        kernel,
        out_shape=jax.ShapeDtypeStruct((A, BE, H), jnp.float32),
        grid=(A,),
        in_specs=[
            pl.BlockSpec((1, BE, Km), lambda a: (a, 0, 0)),
            pl.BlockSpec((1, BE, W), lambda a: (a, 0, 0)),
            pl.BlockSpec((BE, W), lambda a: (0, 0)),
            pl.BlockSpec(params['tree_w1'].shape, lambda a: (0, 0)),
            pl.BlockSpec(params['tree_w2'].shape, lambda a: (0, 0)),
            pl.BlockSpec(params['tree_b'].shape, lambda a: (0, 0)),
            pl.BlockSpec(swx.shape, lambda a: (0, 0, 0)),
            pl.BlockSpec(swh.shape, lambda a: (0, 0, 0)),
            pl.BlockSpec(sb.shape, lambda a: (0, 0, 0)),
        ],
        out_specs=pl.BlockSpec((1, BE, H), lambda a: (a, 0, 0)),
        scratch_shapes=scratch,
        compiler_params=pltpu.CompilerParams(
            dimension_semantics=("arbitrary",)),
    )(pk, wv_steps, init_emb, params['tree_w1'], params['tree_w2'],
      params['tree_b'], swx, swh, sb)


# ---------------------------------------------------------------------------
# Pallas kernel: fused action scorer + tied-weight vocab log-softmax
# ---------------------------------------------------------------------------
def _score_kernel(ctx_ref, embt_ref, vb_ref, aw_ref, ab_ref, act_ref, amask_ref,
                  ids_ref, smat_ref, out_ref):
    """Reads the contexts once; [N, Vp] logits stay in VMEM.  The vocab is
    padded to a 128-lane multiple with a -1e30 bias so the log-softmax is
    unchanged.  The per-row scores are reduced over action steps in-kernel
    (group-sum matmul), so only [BE, 2] ever hits HBM."""
    ctx = ctx_ref[...]                                           # [N, h]
    logits = (jnp.dot(ctx, embt_ref[...], preferred_element_type=jnp.float32)
              + vb_ref[...])                                     # [N, Vp]
    m = jnp.max(logits, axis=1, keepdims=True)
    lse = jnp.log(jnp.sum(jnp.exp(logits - m), axis=1, keepdims=True)) + m
    lp = logits - lse
    cols = jax.lax.broadcasted_iota(jnp.int32, logits.shape, 1)
    lp_tgt = jnp.sum(jnp.where(cols == ids_ref[...], lp, 0.0),
                     axis=1, keepdims=True)                      # [N, 1]

    a = act_ref[...]                                             # [N, 1]
    msk = amask_ref[...]                                         # [N, 1]
    alogit = jnp.sum(ctx * aw_ref[...], axis=1, keepdims=True) + ab_ref[...]
    p = jnp.clip(jax.nn.sigmoid(alogit), 1e-7, 1.0 - 1e-7)
    ascore = ((1.0 - a) * jnp.log(1.0 - p) + a * jnp.log(p)) * msk
    wscore = lp_tgt * (1.0 - a)

    smat = smat_ref[...]                                         # [BE, N]
    asum = jnp.dot(smat, ascore, preferred_element_type=jnp.float32)
    wsum = jnp.dot(smat, wscore, preferred_element_type=jnp.float32)
    out_ref[...] = jnp.concatenate([asum, wsum], axis=1)         # [BE, 2]


def score_call(params, emb_t, vocab_b, ctx, act, amask, ids, sum_mat):
    BE = sum_mat.shape[0]
    return pl.pallas_call(
        _score_kernel,
        out_shape=jax.ShapeDtypeStruct((BE, 2), jnp.float32),
        in_specs=[_vmem()] * 9,
        out_specs=_vmem(),
    )(ctx, emb_t, vocab_b, params['act_w'], params['act_b'],
      act, amask, ids, sum_mat)


# ---------------------------------------------------------------------------
# Model pieces (JAX glue around the Pallas kernels)
# ---------------------------------------------------------------------------
def get_span_scores(params, x_ids):
    B, n = x_ids.shape
    bos = jnp.full((B, 1), PAD1, dtype=x_ids.dtype)
    eos = jnp.full((B, 1), PAD2, dtype=x_ids.dtype)
    xx = jnp.concatenate([bos, x_ids, eos], axis=1)          # [B, T]
    T = n + 2
    x_vec = jnp.take(params['emb'], xx, axis=0)              # [B, T, w]  (dropout=0)
    x_vec = x_vec + params['q_pos_emb'][:T][None, :, :]
    x_tbw = jnp.transpose(x_vec, (1, 0, 2))                  # [T, B, w]

    # Input projections for all time steps as one matmul each; the in-kernel
    # recurrence only does h @ Wh + gate nonlinearities.
    xp_f = jnp.einsum('tbw,wg->tbg', x_tbw, params['q_wx_fwd']) + params['q_b_fwd'][None]
    xp_b = jnp.einsum('tbw,wg->tbg', x_tbw, params['q_wx_bwd']) + params['q_b_bwd'][None]
    xp2 = jnp.stack([xp_f, xp_b[::-1]], axis=0)              # [2, T, B, 4q]
    wh2 = jnp.stack([params['q_wh_fwd'], params['q_wh_bwd']], axis=0)
    qh = bilstm(xp2, wh2)                                    # [2, T, B, q]
    fwd_h = qh[0]
    bwd_h = qh[1][::-1]

    fwd = fwd_h[1:]        # [n+1, B, q]
    bwd = bwd_h[:-1]       # [n+1, B, q]
    F1, F0 = fwd[1:], fwd[:-1]   # index j -> fwd[j+1], index i -> fwd[i]
    B1, B0 = bwd[1:], bwd[:-1]
    # Affine split of q_binary's first Linear: only these O(n*q) tensors hit HBM.
    Pj = (jnp.einsum('jbq,qe->jbe', F1, params['qb_w1f'])
          - jnp.einsum('jbq,qe->jbe', B1, params['qb_w1b']))
    Qi = (jnp.einsum('ibq,qe->ibe', B0, params['qb_w1b'])
          - jnp.einsum('ibq,qe->ibe', F0, params['qb_w1f']))
    Pj = jnp.transpose(Pj, (1, 0, 2))                        # [B, n, 2q]
    Qi = jnp.transpose(Qi, (1, 0, 2))
    return span_scores_call(params, Pj, Qi)                  # [B, n, n]


def crf_inside(scores):
    """Vectorized constituency-tree-CRF inside pass.
    scores: [B, n, n] -> alpha [n, n, B] (log inside score, -1e30 below diag)."""
    B, n, _ = scores.shape
    sc = jnp.transpose(scores, (1, 2, 0))                    # [n, n, B]
    alpha = jnp.full((n, n, B), -1e30, dtype=jnp.float32)
    d = jnp.arange(n)
    alpha = alpha.at[d, d].set(sc[d, d])
    for k in range(1, n):
        s = jnp.arange(n - k)
        u = jnp.arange(k)
        left = alpha[s[:, None], s[:, None] + u[None, :]]            # [n-k, k, B]
        right = alpha[s[:, None] + u[None, :] + 1, s[:, None] + k]   # [n-k, k, B]
        val = sc[s, s + k] + jax.scipy.special.logsumexp(left + right, axis=1)
        alpha = alpha.at[s, s + k].set(val)
    return alpha


def _sample_tree(alpha_np, n, rng):
    """Top-down ancestral sampling of a binary tree; returns (actions, log q)."""
    actions = []
    logp = [0.0]

    def rec(s, t):
        if s == t:
            actions.append(S_ACT)
            return
        logits = np.array([alpha_np[s, u] + alpha_np[u + 1, t] for u in range(s, t)],
                          dtype=np.float64)
        m = logits.max()
        p = np.exp(logits - m)
        p = p / p.sum()
        u_idx = int(rng.choice(len(p), p=p))
        logp[0] += float(np.log(p[u_idx]))
        u = s + u_idx
        rec(s, u)
        rec(u + 1, t)
        actions.append(R_ACT)

    rec(0, n - 1)
    return actions, logp[0]


def get_action_masks_np(actions_np):
    BE, L = actions_np.shape
    mask = np.ones((BE, L), dtype=np.float32)
    for b in range(BE):
        stack_len = 0
        for l in range(L):
            if stack_len < 2:
                mask[b, l] = 0.0
            if actions_np[b, l] == S_ACT:
                stack_len += 1
            else:
                stack_len -= 1
    return mask


# ---------------------------------------------------------------------------
# RNNG forward
# ---------------------------------------------------------------------------
def rnng_forward(params, x, samples=1, is_temp=1.0, has_eos=True, sample_seed=0):
    w_dim = params['w_dim']
    h_dim = params['h_dim']
    num_layers = params['num_layers']
    # Tied vocab weights (vocab_mlp.weight = emb.weight) require w_dim == h_dim.
    assert w_dim == h_dim

    x_host = np.asarray(jax.device_get(x))
    init_emb = jnp.take(params['emb'], x[:, 0], axis=0)       # [B, w]  (dropout = 0)
    x = x[:, 1:]
    x_host = x_host[:, 1:]
    batch, length = x.shape
    if has_eos:
        parse_length = length - 1
        parse_x = x[:, :-1]
    else:
        parse_length = length
        parse_x = x
    n = parse_length

    # ---- q: span scores + CRF inside / entropy / sampling ----
    scores = get_span_scores(params, parse_x) / is_temp       # [B, n, n]
    alpha = crf_inside(scores)                                # [n, n, B]
    logZ = alpha[0, n - 1]                                    # [B]
    marginals = jax.grad(lambda s: jnp.sum(crf_inside(s)[0, n - 1]))(scores)
    entropy = logZ - jnp.sum(marginals * scores, axis=(1, 2))    # [B]
    # TODO(synk): ConstituencyTreeCRF / get_actions / get_spans sources were not
    # provided; inside pass, entropy (= logZ - E[score]) and top-down ancestral
    # sampling follow the standard constituency-tree-CRF semantics.

    alpha_host = np.asarray(jax.device_get(alpha), dtype=np.float64)  # one D2H copy

    BE = batch * samples
    rng = np.random.RandomState(sample_seed)
    actions_list, logq_list = [], []
    for be in range(BE):
        b_orig = be // samples
        acts, logq = _sample_tree(alpha_host[:, :, b_orig], n, rng)
        if has_eos:
            acts = acts + [S_ACT, R_ACT]
        actions_list.append(acts)
        logq_list.append(logq)
    actions_np = np.asarray(actions_list, dtype=np.float32)      # [BE, A]
    log_probs_action_q = jnp.asarray(np.asarray(logq_list, dtype=np.float32))

    A = 2 * length - 1
    assert actions_np.shape[1] == A
    action_masks_np = get_action_masks_np(actions_np)            # [BE, A]

    # ---- host precomputation of every data-dependent index (the control flow)
    max_dc = length + 2
    max_d2 = A + 2
    x_exp_np = np.repeat(x_host[:, None, :], samples, axis=1).reshape(BE, length)

    red_np = np.zeros((A, BE), np.float32)
    i1 = np.zeros((A, BE), np.int64)
    i2 = np.zeros((A, BE), np.int64)
    ci = np.zeros((A, BE), np.int64)
    piA = np.zeros((A, BE), np.int64)
    siA = np.zeros((A, BE), np.int64)
    pidx = np.zeros((A, BE), np.int64)
    ids_np = np.zeros((A, BE), np.int32)

    d2 = np.ones(BE, np.int64)      # stack-RNN depth (incl. init state)
    dc = np.zeros(BE, np.int64)     # constituent stack depth
    ptr = np.zeros(BE, np.int64)    # word pointer / shift count
    for l in range(A):
        r = actions_np[:, l] == R_ACT
        red_np[l] = r.astype(np.float32)
        i1[l] = np.maximum(dc - 1, 0)
        i2[l] = np.maximum(dc - 2, 0)
        p_clamp = np.minimum(ptr, length - 1)
        pidx[l] = p_clamp
        ids_np[l] = np.where(r, 0,
                             x_exp_np[np.arange(BE), p_clamp]).astype(np.int32)
        dc = dc - 2 * r.astype(np.int64) + 1
        ci[l] = dc - 1
        pi = np.maximum(np.where(r, d2 - 3, d2 - 1), 0)
        piA[l] = pi
        siA[l] = pi + 1
        d2 = pi + 2
        ptr = ptr + (~r)

    def onehot(idx, depth):
        return (idx[..., None] == np.arange(depth)[None, None, :]).astype(np.float32)

    pk_np = np.concatenate(
        [red_np[..., None],
         onehot(i1, max_dc), onehot(i2, max_dc), onehot(ci, max_dc),
         onehot(piA, max_d2), onehot(siA, max_d2)], axis=2)      # [A, BE, Km]
    pk = jnp.asarray(pk_np)

    # ---- generative model p: one fused kernel for the whole action loop ----
    x_expand = jnp.broadcast_to(x[:, None, :],
                                (batch, samples, length)).reshape(BE, length)
    word_vecs = jnp.take(params['emb'], x_expand, axis=0)        # [BE, length, w]
    flat_wv = word_vecs.reshape(BE * length, w_dim)
    gidx = (np.arange(BE)[None, :] * length + pidx).reshape(-1).astype(np.int32)
    wv_steps = jnp.take(flat_wv, jnp.asarray(gidx), axis=0).reshape(A, BE, w_dim)

    init_emb_exp = jnp.broadcast_to(init_emb[:, None, :],
                                    (batch, samples, w_dim)).reshape(BE, w_dim)

    contexts = action_loop_call(params, pk, wv_steps, init_emb_exp,
                                max_dc, max_d2)                  # [A, BE, h]
    ctx_flat = contexts.reshape(A * BE, h_dim)

    # ---- fused action scorer + tied-weight vocab log-softmax ----
    vocab = params['emb'].shape[0]
    Vp = ((vocab + 127) // 128) * 128
    emb_t = jnp.transpose(params['emb'])                         # [h, vocab]
    emb_t = jnp.pad(emb_t, ((0, 0), (0, Vp - vocab)))
    vocab_b = jnp.pad(params['vocab_b'], ((0, 0), (0, Vp - vocab)),
                      constant_values=-1e30)

    N = A * BE
    sum_mat = np.zeros((BE, N), np.float32)
    for b in range(BE):
        sum_mat[b, b::BE] = 1.0        # row index of ctx_flat is l*BE + b

    out2 = score_call(params, emb_t, vocab_b, ctx_flat,
                      jnp.asarray(actions_np.T.reshape(N, 1)),
                      jnp.asarray(action_masks_np.T.reshape(N, 1)),
                      jnp.asarray(ids_np.reshape(N, 1)),
                      jnp.asarray(sum_mat))                      # [BE, 2]

    log_probs_action_p = out2[:, 0].reshape(batch, samples)
    log_probs_word = out2[:, 1].reshape(batch, samples)
    log_probs_action_q = log_probs_action_q.reshape(batch, samples)
    actions_out = jnp.asarray(actions_np).reshape(batch, samples, -1)
    return log_probs_word, log_probs_action_p, log_probs_action_q, actions_out, entropy


# ---------------------------------------------------------------------------
# Deterministic parameter init (matching the module's shapes; synthetic values)
# ---------------------------------------------------------------------------
def init_params(key, vocab=100, w_dim=20, h_dim=20, q_dim=20, num_layers=1, max_len=64):
    keys = jax.random.split(key, 16)

    def lin(k, out_f, in_f, scale=0.1):
        kw, kb = jax.random.split(k)
        return (jax.random.normal(kw, (out_f, in_f), jnp.float32) * scale,
                jax.random.normal(kb, (1, out_f), jnp.float32) * scale)

    p = {'w_dim': w_dim, 'h_dim': h_dim, 'q_dim': q_dim, 'num_layers': num_layers}
    p['emb'] = jax.random.normal(keys[0], (vocab, w_dim), jnp.float32) * 0.1
    p['q_pos_emb'] = jax.random.normal(keys[1], (max_len, w_dim), jnp.float32) * 0.1

    # stack_rnn (SeqLSTM): layer 0 Linear(h+w, 4h) on cat([x, h]); deeper Linear(2h, 4h).
    # Stored pre-split / pre-transposed: wx [in, 4h], wh [h, 4h].
    stack_wx, stack_wh, stack_b = [], [], []
    for l in range(num_layers):
        in_x = w_dim if l == 0 else h_dim
        w, b = lin(keys[2 + l], 4 * h_dim, in_x + h_dim)
        stack_wx.append(jnp.transpose(w[:, :in_x]))
        stack_wh.append(jnp.transpose(w[:, in_x:]))
        stack_b.append(b)
    p['stack_wx'] = stack_wx
    p['stack_wh'] = stack_wh
    p['stack_b'] = stack_b

    # tree_rnn: Linear(2w, 5w) on cat([h1, h2]), pre-split / pre-transposed.
    tw, tb = lin(keys[6], 5 * w_dim, 2 * w_dim)
    p['tree_w1'] = jnp.transpose(tw[:, :w_dim])
    p['tree_w2'] = jnp.transpose(tw[:, w_dim:])
    p['tree_b'] = tb

    # vocab_mlp: Linear(h, vocab) with weight tied to emb; independent bias.
    p['vocab_b'] = jax.random.normal(keys[7], (1, vocab), jnp.float32) * 0.1

    # q_binary: Linear(2q,2q) -> ReLU -> LayerNorm(2q) -> Linear(2q,1),
    # first Linear pre-split into the fwd-diff / bwd-diff halves.
    w1, b1 = lin(keys[8], 2 * q_dim, 2 * q_dim)
    w1t = jnp.transpose(w1)                       # [2q(in), 2q(out)]
    p['qb_w1f'] = w1t[:q_dim]
    p['qb_w1b'] = w1t[q_dim:]
    p['qb_b1'] = b1
    p['qb_gamma'] = jnp.ones((1, 2 * q_dim), jnp.float32)
    p['qb_beta'] = jnp.zeros((1, 2 * q_dim), jnp.float32)
    p['qb_w2'], p['qb_b2'] = lin(keys[9], 1, 2 * q_dim)   # [1,2q], [1,1]

    # action_mlp_p: Linear(h, 1)
    p['act_w'], p['act_b'] = lin(keys[10], 1, h_dim)      # [1,h], [1,1]

    # q_leaf_rnn: bidirectional nn.LSTM(w, q) — PyTorch gate order (i,f,g,o)
    # repacked into (i,f,o,g) and pre-transposed into Wx [w,4q], Wh [q,4q].
    def lstm_dir(k):
        k1, k2, k3, k4 = jax.random.split(k, 4)
        w_ih = jax.random.normal(k1, (4 * q_dim, w_dim), jnp.float32) * 0.1
        w_hh = jax.random.normal(k2, (4 * q_dim, q_dim), jnp.float32) * 0.1
        b_ih = jax.random.normal(k3, (4 * q_dim,), jnp.float32) * 0.1
        b_hh = jax.random.normal(k4, (4 * q_dim,), jnp.float32) * 0.1
        perm = np.concatenate([np.arange(0, q_dim), np.arange(q_dim, 2 * q_dim),
                               np.arange(3 * q_dim, 4 * q_dim),
                               np.arange(2 * q_dim, 3 * q_dim)])
        wx = jnp.transpose(w_ih[perm])
        wh = jnp.transpose(w_hh[perm])
        b = (b_ih + b_hh)[perm][None, :]
        return wx, wh, b

    p['q_wx_fwd'], p['q_wh_fwd'], p['q_b_fwd'] = lstm_dir(keys[11])
    p['q_wx_bwd'], p['q_wh_bwd'], p['q_b_bwd'] = lstm_dir(keys[12])
    return p


if __name__ == "__main__":
    key = jax.random.PRNGKey(0)
    kp, kx = jax.random.split(key)
    vocab, w_dim, h_dim, q_dim = 100, 20, 20, 20
    params = init_params(kp, vocab=vocab, w_dim=w_dim, h_dim=h_dim,
                         q_dim=q_dim, num_layers=1, max_len=64)

    batch, seq = 2, 7          # x[:,0] = start symbol; length=6; parse_length=5
    x = jax.random.randint(kx, (batch, seq), 3, vocab, dtype=jnp.int32)

    outs = rnng_forward(params, x, samples=2, is_temp=1.0, has_eos=True)
    outs = jax.block_until_ready(outs)
    print("KERNEL_OK")
</pallas_src>

<mosaic_0001>
module attributes {stable_mosaic.version = 11 : i64} {
  func.func @_bilstm_kernel(%arg0: i32, %arg1: memref<1x7x2x80xf32, #tpu.memory_space<vmem>>, %arg2: memref<1x20x80xf32, #tpu.memory_space<vmem>>, %arg3: memref<1x7x2x20xf32, #tpu.memory_space<vmem>>, %arg4: memref<2x20xf32, #tpu.memory_space<vmem>>, %arg5: memref<2x20xf32, #tpu.memory_space<vmem>>) attributes {dimension_semantics = [#tpu.dimension_semantics<parallel>], iteration_bounds = array<i64: 2>, scalar_prefetch = 0 : i64, scratch_operands = 2 : i64, tpu.core_type = #tpu.core_type<tc>, window_params = [{transform_indices = @transform_0, window_bounds = array<i64: 1, 7, 2, 80>}, {transform_indices = @transform_1, window_bounds = array<i64: 1, 20, 80>}, {transform_indices = @transform_2, window_bounds = array<i64: 1, 7, 2, 20>}]} {
    %cst = arith.constant 0.000000e+00 : f32
    %0 = vector.broadcast %cst : f32 to vector<2x20xf32>
    %c0 = arith.constant 0 : index
    %c0_0 = arith.constant 0 : index
    %1 = vector.load %arg4[%c0, %c0_0] : memref<2x20xf32, #tpu.memory_space<vmem>>, vector<2x20xf32>
    tpu.vector_store %arg4[%c0, %c0_0], %0 {strides = array<i32>} : memref<2x20xf32, #tpu.memory_space<vmem>>, vector<2x20xf32>,
    %cst_1 = arith.constant 0.000000e+00 : f32
    %2 = vector.broadcast %cst_1 : f32 to vector<2x20xf32>
    %c0_2 = arith.constant 0 : index
    %c0_3 = arith.constant 0 : index
    %3 = vector.load %arg5[%c0_2, %c0_3] : memref<2x20xf32, #tpu.memory_space<vmem>>, vector<2x20xf32>
    tpu.vector_store %arg5[%c0_2, %c0_3], %2 {strides = array<i32>} : memref<2x20xf32, #tpu.memory_space<vmem>>, vector<2x20xf32>,
    %c0_4 = arith.constant 0 : index
    %c0_5 = arith.constant 0 : index
    %c0_6 = arith.constant 0 : index
    %4 = vector.load %arg2[%c0_4, %c0_5, %c0_6] : memref<1x20x80xf32, #tpu.memory_space<vmem>>, vector<1x20x80xf32>
    %5 = vector.shape_cast %4 : vector<1x20x80xf32> to vector<20x80xf32>
    %c0_7 = arith.constant 0 : index
    %c0_8 = arith.constant 0 : index
    %c0_9 = arith.constant 0 : index
    %c0_10 = arith.constant 0 : index
    %6 = vector.load %arg1[%c0_7, %c0_8, %c0_9, %c0_10] : memref<1x7x2x80xf32, #tpu.memory_space<vmem>>, vector<1x1x2x80xf32>
    %7 = vector.shape_cast %6 : vector<1x1x2x80xf32> to vector<2x80xf32>
    %c0_11 = arith.constant 0 : index
    %c0_12 = arith.constant 0 : index
    %8 = vector.load %arg4[%c0_11, %c0_12] : memref<2x20xf32, #tpu.memory_space<vmem>>, vector<2x20xf32>
    %cst_13 = arith.constant dense<0.000000e+00> : vector<2x80xf32>
    %9 = tpu.matmul %8, %5, %cst_13 {dimension_numbers = #tpu.dot_dimension_numbers<[1], [0], [0], [1], [0, 0, 1, 1], [], []>} : vector<2x20xf32>, vector<20x80xf32>, vector<2x80xf32> -> vector<2x80xf32>
    %10 = arith.addf %7, %9 : vector<2x80xf32>
    %11 = vector.extract_strided_slice %10 {offsets = [0, 0], sizes = [2, 20], strides = [1, 1]} : vector<2x80xf32> to vector<2x20xf32>
    %12 = vector.extract_strided_slice %10 {offsets = [0, 20], sizes = [2, 20], strides = [1, 1]} : vector<2x80xf32> to vector<2x20xf32>
    %13 = vector.extract_strided_slice %10 {offsets = [0, 40], sizes = [2, 20], strides = [1, 1]} : vector<2x80xf32> to vector<2x20xf32>
    %14 = vector.extract_strided_slice %10 {offsets = [0, 60], sizes = [2, 20], strides = [1, 1]} : vector<2x80xf32> to vector<2x20xf32>
    %15 = arith.negf %12 : vector<2x20xf32>
    %16 = math.exp %15 : vector<2x20xf32>
    %cst_14 = arith.constant 1.000000e+00 : f32
    %17 = vector.broadcast %cst_14 : f32 to vector<2x20xf32>
    %18 = arith.addf %17, %16 : vector<2x20xf32>
    %19 = arith.divf %17, %18 : vector<2x20xf32>
    %c0_15 = arith.constant 0 : index
    %c0_16 = arith.constant 0 : index
    %20 = vector.load %arg5[%c0_15, %c0_16] : memref<2x20xf32, #tpu.memory_space<vmem>>, vector<2x20xf32>
    %21 = arith.mulf %19, %20 : vector<2x20xf32>
    %22 = arith.negf %11 : vector<2x20xf32>
    %23 = math.exp %22 : vector<2x20xf32>
    %cst_17 = arith.constant 1.000000e+00 : f32
    %24 = vector.broadcast %cst_17 : f32 to vector<2x20xf32>
    %25 = arith.addf %24, %23 : vector<2x20xf32>
    %26 = arith.divf %24, %25 : vector<2x20xf32>
    %27 = math.tanh %14 : vector<2x20xf32>
    %28 = arith.mulf %26, %27 : vector<2x20xf32>
    %29 = arith.addf %21, %28 : vector<2x20xf32>
    %30 = arith.negf %13 : vector<2x20xf32>
    %31 = math.exp %30 : vector<2x20xf32>
    %cst_18 = arith.constant 1.000000e+00 : f32
    %32 = vector.broadcast %cst_18 : f32 to vector<2x20xf32>
    %33 = arith.addf %32, %31 : vector<2x20xf32>
    %34 = arith.divf %32, %33 : vector<2x20xf32>
    %35 = math.tanh %29 : vector<2x20xf32>
    %36 = arith.mulf %34, %35 : vector<2x20xf32>
    %c0_19 = arith.constant 0 : index
    %c0_20 = arith.constant 0 : index
    %37 = vector.load %arg4[%c0_19, %c0_20] : memref<2x20xf32, #tpu.memory_space<vmem>>, vector<2x20xf32>
    tpu.vector_store %arg4[%c0_19, %c0_20], %36 {strides = array<i32>} : memref<2x20xf32, #tpu.memory_space<vmem>>, vector<2x20xf32>,
    %c0_21 = arith.constant 0 : index
    %c0_22 = arith.constant 0 : index
    %38 = vector.load %arg5[%c0_21, %c0_22] : memref<2x20xf32, #tpu.memory_space<vmem>>, vector<2x20xf32>
    tpu.vector_store %arg5[%c0_21, %c0_22], %29 {strides = array<i32>} : memref<2x20xf32, #tpu.memory_space<vmem>>, vector<2x20xf32>,
    %c0_23 = arith.constant 0 : index
    %c0_24 = arith.constant 0 : index
    %c0_25 = arith.constant 0 : index
    %c0_26 = arith.constant 0 : index
    %39 = vector.load %arg3[%c0_23, %c0_24, %c0_25, %c0_26] : memref<1x7x2x20xf32, #tpu.memory_space<vmem>>, vector<1x1x2x20xf32>
    %40 = vector.shape_cast %39 : vector<1x1x2x20xf32> to vector<2x20xf32>
    %41 = vector.shape_cast %36 : vector<2x20xf32> to vector<1x1x2x20xf32>
    tpu.vector_store %arg3[%c0_23, %c0_24, %c0_25, %c0_26], %41 {strides = array<i32>} : memref<1x7x2x20xf32, #tpu.memory_space<vmem>>, vector<1x1x2x20xf32>,
    %c0_27 = arith.constant 0 : index
    %c1 = arith.constant 1 : index
    %c0_28 = arith.constant 0 : index
    %c0_29 = arith.constant 0 : index
    %42 = vector.load %arg1[%c0_27, %c1, %c0_28, %c0_29] : memref<1x7x2x80xf32, #tpu.memory_space<vmem>>, vector<1x1x2x80xf32>
    %43 = vector.shape_cast %42 : vector<1x1x2x80xf32> to vector<2x80xf32>
    %c0_30 = arith.constant 0 : index
    %c0_31 = arith.constant 0 : index
    %44 = vector.load %arg4[%c0_30, %c0_31] : memref<2x20xf32, #tpu.memory_space<vmem>>, vector<2x20xf32>
    %cst_32 = arith.constant dense<0.000000e+00> : vector<2x80xf32>
    %45 = tpu.matmul %44, %5, %cst_32 {dimension_numbers = #tpu.dot_dimension_numbers<[1], [0], [0], [1], [0, 0, 1, 1], [], []>} : vector<2x20xf32>, vector<20x80xf32>, vector<2x80xf32> -> vector<2x80xf32>
    %46 = arith.addf %43, %45 : vector<2x80xf32>
    %47 = vector.extract_strided_slice %46 {offsets = [0, 0], sizes = [2, 20], strides = [1, 1]} : vector<2x80xf32> to vector<2x20xf32>
    %48 = vector.extract_strided_slice %46 {offsets = [0, 20], sizes = [2, 20], strides = [1, 1]} : vector<2x80xf32> to vector<2x20xf32>
    %49 = vector.extract_strided_slice %46 {offsets = [0, 40], sizes = [2, 20], strides = [1, 1]} : vector<2x80xf32> to vector<2x20xf32>
    %50 = vector.extract_strided_slice %46 {offsets = [0, 60], sizes = [2, 20], strides = [1, 1]} : vector<2x80xf32> to vector<2x20xf32>
    %51 = arith.negf %48 : vector<2x20xf32>
    %52 = math.exp %51 : vector<2x20xf32>
    %cst_33 = arith.constant 1.000000e+00 : f32
    %53 = vector.broadcast %cst_33 : f32 to vector<2x20xf32>
    %54 = arith.addf %53, %52 : vector<2x20xf32>
    %55 = arith.divf %53, %54 : vector<2x20xf32>
    %c0_34 = arith.constant 0 : index
    %c0_35 = arith.constant 0 : index
    %56 = vector.load %arg5[%c0_34, %c0_35] : memref<2x20xf32, #tpu.memory_space<vmem>>, vector<2x20xf32>
    %57 = arith.mulf %55, %56 : vector<2x20xf32>
    %58 = arith.negf %47 : vector<2x20xf32>
    %59 = math.exp %58 : vector<2x20xf32>
    %cst_36 = arith.constant 1.000000e+00 : f32
    %60 = vector.broadcast %cst_36 : f32 to vector<2x20xf32>
    %61 = arith.addf %60, %59 : vector<2x20xf32>
    %62 = arith.divf %60, %61 : vector<2x20xf32>
    %63 = math.tanh %50 : vector<2x20xf32>
    %64 = arith.mulf %62, %63 : vector<2x20xf32>
    %65 = arith.addf %57, %64 : vector<2x20xf32>
    %66 = arith.negf %49 : vector<2x20xf32>
    %67 = math.exp %66 : vector<2x20xf32>
    %cst_37 = arith.constant 1.000000e+00 : f32
    %68 = vector.broadcast %cst_37 : f32 to vector<2x20xf32>
    %69 = arith.addf %68, %67 : vector<2x20xf32>
    %70 = arith.divf %68, %69 : vector<2x20xf32>
    %71 = math.tanh %65 : vector<2x20xf32>
    %72 = arith.mulf %70, %71 : vector<2x20xf32>
    %c0_38 = arith.constant 0 : index
    %c0_39 = arith.constant 0 : index
    %73 = vector.load %arg4[%c0_38, %c0_39] : memref<2x20xf32, #tpu.memory_space<vmem>>, vector<2x20xf32>
    tpu.vector_store %arg4[%c0_38, %c0_39], %72 {strides = array<i32>} : memref<2x20xf32, #tpu.memory_space<vmem>>, vector<2x20xf32>,
    %c0_40 = arith.constant 0 : index
    %c0_41 = arith.constant 0 : index
    %74 = vector.load %arg5[%c0_40, %c0_41] : memref<2x20xf32, #tpu.memory_space<vmem>>, vector<2x20xf32>
    tpu.vector_store %arg5[%c0_40, %c0_41], %65 {strides = array<i32>} : memref<2x20xf32, #tpu.memory_space<vmem>>, vector<2x20xf32>,
    %c0_42 = arith.constant 0 : index
    %c1_43 = arith.constant 1 : index
    %c0_44 = arith.constant 0 : index
    %c0_45 = arith.constant 0 : index
    %75 = vector.load %arg3[%c0_42, %c1_43, %c0_44, %c0_45] : memref<1x7x2x20xf32, #tpu.memory_space<vmem>>, vector<1x1x2x20xf32>
    %76 = vector.shape_cast %75 : vector<1x1x2x20xf32> to vector<2x20xf32>
    %77 = vector.shape_cast %72 : vector<2x20xf32> to vector<1x1x2x20xf32>
    tpu.vector_store %arg3[%c0_42, %c1_43, %c0_44, %c0_45], %77 {strides = array<i32>} : memref<1x7x2x20xf32, #tpu.memory_space<vmem>>, vector<1x1x2x20xf32>,
    %c0_46 = arith.constant 0 : index
    %c2 = arith.constant 2 : index
    %c0_47 = arith.constant 0 : index
    %c0_48 = arith.constant 0 : index
    %78 = vector.load %arg1[%c0_46, %c2, %c0_47, %c0_48] : memref<1x7x2x80xf32, #tpu.memory_space<vmem>>, vector<1x1x2x80xf32>
    %79 = vector.shape_cast %78 : vector<1x1x2x80xf32> to vector<2x80xf32>
    %c0_49 = arith.constant 0 : index
    %c0_50 = arith.constant 0 : index
    %80 = vector.load %arg4[%c0_49, %c0_50] : memref<2x20xf32, #tpu.memory_space<vmem>>, vector<2x20xf32>
    %cst_51 = arith.constant dense<0.000000e+00> : vector<2x80xf32>
    %81 = tpu.matmul %80, %5, %cst_51 {dimension_numbers = #tpu.dot_dimension_numbers<[1], [0], [0], [1], [0, 0, 1, 1], [], []>} : vector<2x20xf32>, vector<20x80xf32>, vector<2x80xf32> -> vector<2x80xf32>
    %82 = arith.addf %79, %81 : vector<2x80xf32>
    %83 = vector.extract_strided_slice %82 {offsets = [0, 0], sizes = [2, 20], strides = [1, 1]} : vector<2x80xf32> to vector<2x20xf32>
    %84 = vector.extract_strided_slice %82 {offsets = [0, 20], sizes = [2, 20], strides = [1, 1]} : vector<2x80xf32> to vector<2x20xf32>
    %85 = vector.extract_strided_slice %82 {offsets = [0, 40], sizes = [2, 20], strides = [1, 1]} : vector<2x80xf32> to vector<2x20xf32>
    %86 = vector.extract_strided_slice %82 {offsets = [0, 60], sizes = [2, 20], strides = [1, 1]} : vector<2x80xf32> to vector<2x20xf32>
    %87 = arith.negf %84 : vector<2x20xf32>
    %88 = math.exp %87 : vector<2x20xf32>
    %cst_52 = arith.constant 1.000000e+00 : f32
    %89 = vector.broadcast %cst_52 : f32 to vector<2x20xf32>
    %90 = arith.addf %89, %88 : vector<2x20xf32>
    %91 = arith.divf %89, %90 : vector<2x20xf32>
    %c0_53 = arith.constant 0 : index
    %c0_54 = arith.constant 0 : index
    %92 = vector.load %arg5[%c0_53, %c0_54] : memref<2x20xf32, #tpu.memory_space<vmem>>, vector<2x20xf32>
    %93 = arith.mulf %91, %92 : vector<2x20xf32>
    %94 = arith.negf %83 : vector<2x20xf32>
    %95 = math.exp %94 : vector<2x20xf32>
    %cst_55 = arith.constant 1.000000e+00 : f32
    %96 = vector.broadcast %cst_55 : f32 to vector<2x20xf32>
    %97 = arith.addf %96, %95 : vector<2x20xf32>
    %98 = arith.divf %96, %97 : vector<2x20xf32>
    %99 = math.tanh %86 : vector<2x20xf32>
    %100 = arith.mulf %98, %99 : vector<2x20xf32>
    %101 = arith.addf %93, %100 : vector<2x20xf32>
    %102 = arith.negf %85 : vector<2x20xf32>
    %103 = math.exp %102 : vector<2x20xf32>
    %cst_56 = arith.constant 1.000000e+00 : f32
    %104 = vector.broadcast %cst_56 : f32 to vector<2x20xf32>
    %105 = arith.addf %104, %103 : vector<2x20xf32>
    %106 = arith.divf %104, %105 : vector<2x20xf32>
    %107 = math.tanh %101 : vector<2x20xf32>
    %108 = arith.mulf %106, %107 : vector<2x20xf32>
    %c0_57 = arith.constant 0 : index
    %c0_58 = arith.constant 0 : index
    %109 = vector.load %arg4[%c0_57, %c0_58] : memref<2x20xf32, #tpu.memory_space<vmem>>, vector<2x20xf32>
    tpu.vector_store %arg4[%c0_57, %c0_58], %108 {strides = array<i32>} : memref<2x20xf32, #tpu.memory_space<vmem>>, vector<2x20xf32>,
    %c0_59 = arith.constant 0 : index
    %c0_60 = arith.constant 0 : index
    %110 = vector.load %arg5[%c0_59, %c0_60] : memref<2x20xf32, #tpu.memory_space<vmem>>, vector<2x20xf32>
    tpu.vector_store %arg5[%c0_59, %c0_60], %101 {strides = array<i32>} : memref<2x20xf32, #tpu.memory_space<vmem>>, vector<2x20xf32>,
    %c0_61 = arith.constant 0 : index
    %c2_62 = arith.constant 2 : index
    %c0_63 = arith.constant 0 : index
    %c0_64 = arith.constant 0 : index
    %111 = vector.load %arg3[%c0_61, %c2_62, %c0_63, %c0_64] : memref<1x7x2x20xf32, #tpu.memory_space<vmem>>, vector<1x1x2x20xf32>
    %112 = vector.shape_cast %111 : vector<1x1x2x20xf32> to vector<2x20xf32>
    %113 = vector.shape_cast %108 : vector<2x20xf32> to vector<1x1x2x20xf32>
    tpu.vector_store %arg3[%c0_61, %c2_62, %c0_63, %c0_64], %113 {strides = array<i32>} : memref<1x7x2x20xf32, #tpu.memory_space<vmem>>, vector<1x1x2x20xf32>,
    %c0_65 = arith.constant 0 : index
    %c3 = arith.constant 3 : index
    %c0_66 = arith.constant 0 : index
    %c0_67 = arith.constant 0 : index
    %114 = vector.load %arg1[%c0_65, %c3, %c0_66, %c0_67] : memref<1x7x2x80xf32, #tpu.memory_space<vmem>>, vector<1x1x2x80xf32>
    %115 = vector.shape_cast %114 : vector<1x1x2x80xf32> to vector<2x80xf32>
    %c0_68 = arith.constant 0 : index
    %c0_69 = arith.constant 0 : index
    %116 = vector.load %arg4[%c0_68, %c0_69] : memref<2x20xf32, #tpu.memory_space<vmem>>, vector<2x20xf32>
    %cst_70 = arith.constant dense<0.000000e+00> : vector<2x80xf32>
    %117 = tpu.matmul %116, %5, %cst_70 {dimension_numbers = #tpu.dot_dimension_numbers<[1], [0], [0], [1], [0, 0, 1, 1], [], []>} : vector<2x20xf32>, vector<20x80xf32>, vector<2x80xf32> -> vector<2x80xf32>
    %118 = arith.addf %115, %117 : vector<2x80xf32>
    %119 = vector.extract_strided_slice %118 {offsets = [0, 0], sizes = [2, 20], strides = [1, 1]} : vector<2x80xf32> to vector<2x20xf32>
    %120 = vector.extract_strided_slice %118 {offsets = [0, 20], sizes = [2, 20], strides = [1, 1]} : vector<2x80xf32> to vector<2x20xf32>
    %121 = vector.extract_strided_slice %118 {offsets = [0, 40], sizes = [2, 20], strides = [1, 1]} : vector<2x80xf32> to vector<2x20xf32>
    %122 = vector.extract_strided_slice %118 {offsets = [0, 60], sizes = [2, 20], strides = [1, 1]} : vector<2x80xf32> to vector<2x20xf32>
    %123 = arith.negf %120 : vector<2x20xf32>
    %124 = math.exp %123 : vector<2x20xf32>
    %cst_71 = arith.constant 1.000000e+00 : f32
    %125 = vector.broadcast %cst_71 : f32 to vector<2x20xf32>
    %126 = arith.addf %125, %124 : vector<2x20xf32>
    %127 = arith.divf %125, %126 : vector<2x20xf32>
    %c0_72 = arith.constant 0 : index
    %c0_73 = arith.constant 0 : index
    %128 = vector.load %arg5[%c0_72, %c0_73] : memref<2x20xf32, #tpu.memory_space<vmem>>, vector<2x20xf32>
    %129 = arith.mulf %127, %128 : vector<2x20xf32>
    %130 = arith.negf %119 : vector<2x20xf32>
    %131 = math.exp %130 : vector<2x20xf32>
    %cst_74 = arith.constant 1.000000e+00 : f32
    %132 = vector.broadcast %cst_74 : f32 to vector<2x20xf32>
    %133 = arith.addf %132, %131 : vector<2x20xf32>
    %134 = arith.divf %132, %133 : vector<2x20xf32>
    %135 = math.tanh %122 : vector<2x20xf32>
    %136 = arith.mulf %134, %135 : vector<2x20xf32>
    %137 = arith.addf %129, %136 : vector<2x20xf32>
    %138 = arith.negf %121 : vector<2x20xf32>
    %139 = math.exp %138 : vector<2x20xf32>
    %cst_75 = arith.constant 1.000000e+00 : f32
    %140 = vector.broadcast %cst_75 : f32 to vector<2x20xf32>
    %141 = arith.addf %140, %139 : vector<2x20xf32>
    %142 = arith.divf %140, %141 : vector<2x20xf32>
    %143 = math.tanh %137 : vector<2x20xf32>
    %144 = arith.mulf %142, %143 : vector<2x20xf32>
    %c0_76 = arith.constant 0 : index
    %c0_77 = arith.constant 0 : index
    %145 = vector.load %arg4[%c0_76, %c0_77] : memref<2x20xf32, #tpu.memory_space<vmem>>, vector<2x20xf32>
    tpu.vector_store %arg4[%c0_76, %c0_77], %144 {strides = array<i32>} : memref<2x20xf32, #tpu.memory_space<vmem>>, vector<2x20xf32>,
    %c0_78 = arith.constant 0 : index
    %c0_79 = arith.constant 0 : index
    %146 = vector.load %arg5[%c0_78, %c0_79] : memref<2x20xf32, #tpu.memory_space<vmem>>, vector<2x20xf32>
    tpu.vector_store %arg5[%c0_78, %c0_79], %137 {strides = array<i32>} : memref<2x20xf32, #tpu.memory_space<vmem>>, vector<2x20xf32>,
    %c0_80 = arith.constant 0 : index
    %c3_81 = arith.constant 3 : index
    %c0_82 = arith.constant 0 : index
    %c0_83 = arith.constant 0 : index
    %147 = vector.load %arg3[%c0_80, %c3_81, %c0_82, %c0_83] : memref<1x7x2x20xf32, #tpu.memory_space<vmem>>, vector<1x1x2x20xf32>
    %148 = vector.shape_cast %147 : vector<1x1x2x20xf32> to vector<2x20xf32>
    %149 = vector.shape_cast %144 : vector<2x20xf32> to vector<1x1x2x20xf32>
    tpu.vector_store %arg3[%c0_80, %c3_81, %c0_82, %c0_83], %149 {strides = array<i32>} : memref<1x7x2x20xf32, #tpu.memory_space<vmem>>, vector<1x1x2x20xf32>,
    %c0_84 = arith.constant 0 : index
    %c4 = arith.constant 4 : index
    %c0_85 = arith.constant 0 : index
    %c0_86 = arith.constant 0 : index
    %150 = vector.load %arg1[%c0_84, %c4, %c0_85, %c0_86] : memref<1x7x2x80xf32, #tpu.memory_space<vmem>>, vector<1x1x2x80xf32>
    %151 = vector.shape_cast %150 : vector<1x1x2x80xf32> to vector<2x80xf32>
    %c0_87 = arith.constant 0 : index
    %c0_88 = arith.constant 0 : index
    %152 = vector.load %arg4[%c0_87, %c0_88] : memref<2x20xf32, #tpu.memory_space<vmem>>, vector<2x20xf32>
    %cst_89 = arith.constant dense<0.000000e+00> : vector<2x80xf32>
    %153 = tpu.matmul %152, %5, %cst_89 {dimension_numbers = #tpu.dot_dimension_numbers<[1], [0], [0], [1], [0, 0, 1, 1], [], []>} : vector<2x20xf32>, vector<20x80xf32>, vector<2x80xf32> -> vector<2x80xf32>
    %154 = arith.addf %151, %153 : vector<2x80xf32>
    %155 = vector.extract_strided_slice %154 {offsets = [0, 0], sizes = [2, 20], strides = [1, 1]} : vector<2x80xf32> to vector<2x20xf32>
    %156 = vector.extract_strided_slice %154 {offsets = [0, 20], sizes = [2, 20], strides = [1, 1]} : vector<2x80xf32> to vector<2x20xf32>
    %157 = vector.extract_strided_slice %154 {offsets = [0, 40], sizes = [2, 20], strides = [1, 1]} : vector<2x80xf32> to vector<2x20xf32>
    %158 = vector.extract_strided_slice %154 {offsets = [0, 60], sizes = [2, 20], strides = [1, 1]} : vector<2x80xf32> to vector<2x20xf32>
    %159 = arith.negf %156 : vector<2x20xf32>
    %160 = math.exp %159 : vector<2x20xf32>
    %cst_90 = arith.constant 1.000000e+00 : f32
    %161 = vector.broadcast %cst_90 : f32 to vector<2x20xf32>
    %162 = arith.addf %161, %160 : vector<2x20xf32>
    %163 = arith.divf %161, %162 : vector<2x20xf32>
    %c0_91 = arith.constant 0 : index
    %c0_92 = arith.constant 0 : index
    %164 = vector.load %arg5[%c0_91, %c0_92] : memref<2x20xf32, #tpu.memory_space<vmem>>, vector<2x20xf32>
    %165 = arith.mulf %163, %164 : vector<2x20xf32>
    %166 = arith.negf %155 : vector<2x20xf32>
    %167 = math.exp %166 : vector<2x20xf32>
    %cst_93 = arith.constant 1.000000e+00 : f32
    %168 = vector.broadcast %cst_93 : f32 to vector<2x20xf32>
    %169 = arith.addf %168, %167 : vector<2x20xf32>
    %170 = arith.divf %168, %169 : vector<2x20xf32>
    %171 = math.tanh %158 : vector<2x20xf32>
    %172 = arith.mulf %170, %171 : vector<2x20xf32>
    %173 = arith.addf %165, %172 : vector<2x20xf32>
    %174 = arith.negf %157 : vector<2x20xf32>
    %175 = math.exp %174 : vector<2x20xf32>
    %cst_94 = arith.constant 1.000000e+00 : f32
    %176 = vector.broadcast %cst_94 : f32 to vector<2x20xf32>
    %177 = arith.addf %176, %175 : vector<2x20xf32>
    %178 = arith.divf %176, %177 : vector<2x20xf32>
    %179 = math.tanh %173 : vector<2x20xf32>
    %180 = arith.mulf %178, %179 : vector<2x20xf32>
    %c0_95 = arith.constant 0 : index
    %c0_96 = arith.constant 0 : index
    %181 = vector.load %arg4[%c0_95, %c0_96] : memref<2x20xf32, #tpu.memory_space<vmem>>, vector<2x20xf32>
    tpu.vector_store %arg4[%c0_95, %c0_96], %180 {strides = array<i32>} : memref<2x20xf32, #tpu.memory_space<vmem>>, vector<2x20xf32>,
    %c0_97 = arith.constant 0 : index
    %c0_98 = arith.constant 0 : index
    %182 = vector.load %arg5[%c0_97, %c0_98] : memref<2x20xf32, #tpu.memory_space<vmem>>, vector<2x20xf32>
    tpu.vector_store %arg5[%c0_97, %c0_98], %173 {strides = array<i32>} : memref<2x20xf32, #tpu.memory_space<vmem>>, vector<2x20xf32>,
    %c0_99 = arith.constant 0 : index
    %c4_100 = arith.constant 4 : index
    %c0_101 = arith.constant 0 : index
    %c0_102 = arith.constant 0 : index
    %183 = vector.load %arg3[%c0_99, %c4_100, %c0_101, %c0_102] : memref<1x7x2x20xf32, #tpu.memory_space<vmem>>, vector<1x1x2x20xf32>
    %184 = vector.shape_cast %183 : vector<1x1x2x20xf32> to vector<2x20xf32>
    %185 = vector.shape_cast %180 : vector<2x20xf32> to vector<1x1x2x20xf32>
    tpu.vector_store %arg3[%c0_99, %c4_100, %c0_101, %c0_102], %185 {strides = array<i32>} : memref<1x7x2x20xf32, #tpu.memory_space<vmem>>, vector<1x1x2x20xf32>,
    %c0_103 = arith.constant 0 : index
    %c5 = arith.constant 5 : index
    %c0_104 = arith.constant 0 : index
    %c0_105 = arith.constant 0 : index
    %186 = vector.load %arg1[%c0_103, %c5, %c0_104, %c0_105] : memref<1x7x2x80xf32, #tpu.memory_space<vmem>>, vector<1x1x2x80xf32>
    %187 = vector.shape_cast %186 : vector<1x1x2x80xf32> to vector<2x80xf32>
    %c0_106 = arith.constant 0 : index
    %c0_107 = arith.constant 0 : index
    %188 = vector.load %arg4[%c0_106, %c0_107] : memref<2x20xf32, #tpu.memory_space<vmem>>, vector<2x20xf32>
    %cst_108 = arith.constant dense<0.000000e+00> : vector<2x80xf32>
    %189 = tpu.matmul %188, %5, %cst_108 {dimension_numbers = #tpu.dot_dimension_numbers<[1], [0], [0], [1], [0, 0, 1, 1], [], []>} : vector<2x20xf32>, vector<20x80xf32>, vector<2x80xf32> -> vector<2x80xf32>
    %190 = arith.addf %187, %189 : vector<2x80xf32>
    %191 = vector.extract_strided_slice %190 {offsets = [0, 0], sizes = [2, 20], strides = [1, 1]} : vector<2x80xf32> to vector<2x20xf32>
    %192 = vector.extract_strided_slice %190 {offsets = [0, 20], sizes = [2, 20], strides = [1, 1]} : vector<2x80xf32> to vector<2x20xf32>
    %193 = vector.extract_strided_slice %190 {offsets = [0, 40], sizes = [2, 20], strides = [1, 1]} : vector<2x80xf32> to vector<2x20xf32>
    %194 = vector.extract_strided_slice %190 {offsets = [0, 60], sizes = [2, 20], strides = [1, 1]} : vector<2x80xf32> to vector<2x20xf32>
    %195 = arith.negf %192 : vector<2x20xf32>
    %196 = math.exp %195 : vector<2x20xf32>
    %cst_109 = arith.constant 1.000000e+00 : f32
    %197 = vector.broadcast %cst_109 : f32 to vector<2x20xf32>
    %198 = arith.addf %197, %196 : vector<2x20xf32>
    %199 = arith.divf %197, %198 : vector<2x20xf32>
    %c0_110 = arith.constant 0 : index
    %c0_111 = arith.constant 0 : index
    %200 = vector.load %arg5[%c0_110, %c0_111] : memref<2x20xf32, #tpu.memory_space<vmem>>, vector<2x20xf32>
    %201 = arith.mulf %199, %200 : vector<2x20xf32>
    %202 = arith.negf %191 : vector<2x20xf32>
    %203 = math.exp %202 : vector<2x20xf32>
    %cst_112 = arith.constant 1.000000e+00 : f32
    %204 = vector.broadcast %cst_112 : f32 to vector<2x20xf32>
    %205 = arith.addf %204, %203 : vector<2x20xf32>
    %206 = arith.divf %204, %205 : vector<2x20xf32>
    %207 = math.tanh %194 : vector<2x20xf32>
    %208 = arith.mulf %206, %207 : vector<2x20xf32>
    %209 = arith.addf %201, %208 : vector<2x20xf32>
    %210 = arith.negf %193 : vector<2x20xf32>
    %211 = math.exp %210 : vector<2x20xf32>
    %cst_113 = arith.constant 1.000000e+00 : f32
    %212 = vector.broadcast %cst_113 : f32 to vector<2x20xf32>
    %213 = arith.addf %212, %211 : vector<2x20xf32>
    %214 = arith.divf %212, %213 : vector<2x20xf32>
    %215 = math.tanh %209 : vector<2x20xf32>
    %216 = arith.mulf %214, %215 : vector<2x20xf32>
    %c0_114 = arith.constant 0 : index
    %c0_115 = arith.constant 0 : index
    %217 = vector.load %arg4[%c0_114, %c0_115] : memref<2x20xf32, #tpu.memory_space<vmem>>, vector<2x20xf32>
    tpu.vector_store %arg4[%c0_114, %c0_115], %216 {strides = array<i32>} : memref<2x20xf32, #tpu.memory_space<vmem>>, vector<2x20xf32>,
    %c0_116 = arith.constant 0 : index
    %c0_117 = arith.constant 0 : index
    %218 = vector.load %arg5[%c0_116, %c0_117] : memref<2x20xf32, #tpu.memory_space<vmem>>, vector<2x20xf32>
    tpu.vector_store %arg5[%c0_116, %c0_117], %209 {strides = array<i32>} : memref<2x20xf32, #tpu.memory_space<vmem>>, vector<2x20xf32>,
    %c0_118 = arith.constant 0 : index
    %c5_119 = arith.constant 5 : index
    %c0_120 = arith.constant 0 : index
    %c0_121 = arith.constant 0 : index
    %219 = vector.load %arg3[%c0_118, %c5_119, %c0_120, %c0_121] : memref<1x7x2x20xf32, #tpu.memory_space<vmem>>, vector<1x1x2x20xf32>
    %220 = vector.shape_cast %219 : vector<1x1x2x20xf32> to vector<2x20xf32>
    %221 = vector.shape_cast %216 : vector<2x20xf32> to vector<1x1x2x20xf32>
    tpu.vector_store %arg3[%c0_118, %c5_119, %c0_120, %c0_121], %221 {strides = array<i32>} : memref<1x7x2x20xf32, #tpu.memory_space<vmem>>, vector<1x1x2x20xf32>,
    %c0_122 = arith.constant 0 : index
    %c6 = arith.constant 6 : index
    %c0_123 = arith.constant 0 : index
    %c0_124 = arith.constant 0 : index
    %222 = vector.load %arg1[%c0_122, %c6, %c0_123, %c0_124] : memref<1x7x2x80xf32, #tpu.memory_space<vmem>>, vector<1x1x2x80xf32>
    %223 = vector.shape_cast %222 : vector<1x1x2x80xf32> to vector<2x80xf32>
    %c0_125 = arith.constant 0 : index
    %c0_126 = arith.constant 0 : index
    %224 = vector.load %arg4[%c0_125, %c0_126] : memref<2x20xf32, #tpu.memory_space<vmem>>, vector<2x20xf32>
    %cst_127 = arith.constant dense<0.000000e+00> : vector<2x80xf32>
    %225 = tpu.matmul %224, %5, %cst_127 {dimension_numbers = #tpu.dot_dimension_numbers<[1], [0], [0], [1], [0, 0, 1, 1], [], []>} : vector<2x20xf32>, vector<20x80xf32>, vector<2x80xf32> -> vector<2x80xf32>
    %226 = arith.addf %223, %225 : vector<2x80xf32>
    %227 = vector.extract_strided_slice %226 {offsets = [0, 0], sizes = [2, 20], strides = [1, 1]} : vector<2x80xf32> to vector<2x20xf32>
    %228 = vector.extract_strided_slice %226 {offsets = [0, 20], sizes = [2, 20], strides = [1, 1]} : vector<2x80xf32> to vector<2x20xf32>
    %229 = vector.extract_strided_slice %226 {offsets = [0, 40], sizes = [2, 20], strides = [1, 1]} : vector<2x80xf32> to vector<2x20xf32>
    %230 = vector.extract_strided_slice %226 {offsets = [0, 60], sizes = [2, 20], strides = [1, 1]} : vector<2x80xf32> to vector<2x20xf32>
    %231 = arith.negf %228 : vector<2x20xf32>
    %232 = math.exp %231 : vector<2x20xf32>
    %cst_128 = arith.constant 1.000000e+00 : f32
    %233 = vector.broadcast %cst_128 : f32 to vector<2x20xf32>
    %234 = arith.addf %233, %232 : vector<2x20xf32>
    %235 = arith.divf %233, %234 : vector<2x20xf32>
    %c0_129 = arith.constant 0 : index
    %c0_130 = arith.constant 0 : index
    %236 = vector.load %arg5[%c0_129, %c0_130] : memref<2x20xf32, #tpu.memory_space<vmem>>, vector<2x20xf32>
    %237 = arith.mulf %235, %236 : vector<2x20xf32>
    %238 = arith.negf %227 : vector<2x20xf32>
    %239 = math.exp %238 : vector<2x20xf32>
    %cst_131 = arith.constant 1.000000e+00 : f32
    %240 = vector.broadcast %cst_131 : f32 to vector<2x20xf32>
    %241 = arith.addf %240, %239 : vector<2x20xf32>
    %242 = arith.divf %240, %241 : vector<2x20xf32>
    %243 = math.tanh %230 : vector<2x20xf32>
    %244 = arith.mulf %242, %243 : vector<2x20xf32>
    %245 = arith.addf %237, %244 : vector<2x20xf32>
    %246 = arith.negf %229 : vector<2x20xf32>
    %247 = math.exp %246 : vector<2x20xf32>
    %cst_132 = arith.constant 1.000000e+00 : f32
    %248 = vector.broadcast %cst_132 : f32 to vector<2x20xf32>
    %249 = arith.addf %248, %247 : vector<2x20xf32>
    %250 = arith.divf %248, %249 : vector<2x20xf32>
    %251 = math.tanh %245 : vector<2x20xf32>
    %252 = arith.mulf %250, %251 : vector<2x20xf32>
    %c0_133 = arith.constant 0 : index
    %c0_134 = arith.constant 0 : index
    %253 = vector.load %arg4[%c0_133, %c0_134] : memref<2x20xf32, #tpu.memory_space<vmem>>, vector<2x20xf32>
    tpu.vector_store %arg4[%c0_133, %c0_134], %252 {strides = array<i32>} : memref<2x20xf32, #tpu.memory_space<vmem>>, vector<2x20xf32>,
    %c0_135 = arith.constant 0 : index
    %c0_136 = arith.constant 0 : index
    %254 = vector.load %arg5[%c0_135, %c0_136] : memref<2x20xf32, #tpu.memory_space<vmem>>, vector<2x20xf32>
    tpu.vector_store %arg5[%c0_135, %c0_136], %245 {strides = array<i32>} : memref<2x20xf32, #tpu.memory_space<vmem>>, vector<2x20xf32>,
    %c0_137 = arith.constant 0 : index
    %c6_138 = arith.constant 6 : index
    %c0_139 = arith.constant 0 : index
    %c0_140 = arith.constant 0 : index
    %255 = vector.load %arg3[%c0_137, %c6_138, %c0_139, %c0_140] : memref<1x7x2x20xf32, #tpu.memory_space<vmem>>, vector<1x1x2x20xf32>
    %256 = vector.shape_cast %255 : vector<1x1x2x20xf32> to vector<2x20xf32>
    %257 = vector.shape_cast %252 : vector<2x20xf32> to vector<1x1x2x20xf32>
    tpu.vector_store %arg3[%c0_137, %c6_138, %c0_139, %c0_140], %257 {strides = array<i32>} : memref<1x7x2x20xf32, #tpu.memory_space<vmem>>, vector<1x1x2x20xf32>,
    return
  }
  func.func @transform_0(%arg0: i32) -> (i32, i32, i32, i32) {
    %c0_i32 = arith.constant 0 : i32
    %c0_i32_0 = arith.constant 0 : i32
    %c0_i32_1 = arith.constant 0 : i32
    %c0_i32_2 = arith.constant 0 : i32
    return %arg0, %c0_i32, %c0_i32_0, %c0_i32_1 : i32, i32, i32, i32
  }
  func.func @transform_1(%arg0: i32) -> (i32, i32, i32) {
    %c0_i32 = arith.constant 0 : i32
    %c0_i32_0 = arith.constant 0 : i32
    %c0_i32_1 = arith.constant 0 : i32
    return %arg0, %c0_i32, %c0_i32_0 : i32, i32, i32
  }
  func.func @transform_2(%arg0: i32) -> (i32, i32, i32, i32) {
    %c0_i32 = arith.constant 0 : i32
    %c0_i32_0 = arith.constant 0 : i32
    %c0_i32_1 = arith.constant 0 : i32
    %c0_i32_2 = arith.constant 0 : i32
    return %arg0, %c0_i32, %c0_i32_0, %c0_i32_1 : i32, i32, i32, i32
  }
}

</mosaic_0001>

<bundles_post_ra>
// kernel: tpu_custom_call.1
= control target key start
LH: loop header
LB: loop body
LE: loop exit
PB: predicated region body
PF: predicated region fallthrough
CT: control target
= control target key end

     0   :  { %7 = vsyncpa [#allocation5], 0  ;;  %s1256_s0 = inlined_call_operand.vmem [shape: f32[2,7,2,80], index: 0, kind: input, shape index: {}]   ;;  %s1257_s1 = inlined_call_operand.vmem [shape: f32[2,20,80], index: 1, kind: input, shape index: {}]   ;;  %s1258_s2 = inlined_call_operand.hbm [shape: f32[2,7,2,20], index: 2, kind: output, shape index: {}]  }
   0x1   :  { %9 = vsyncpa [#allocation5 + $0x1], 0  ;;  %s1062_s9 = smov 0   ;;  %s1064_s10 = smov 0  }
   0x2   :  { %s1066_s11 = smov 0   ;;  %s1068_s12 = smov 0  }
   0x3 LB: > { %s1083_s13 = sadd.s32 4294967295, %s1038_s12   ;;  %s828_s14 = sadd.s32 4294967294, %s1038_s12   ;;  %s1038_s12 = sphi %s1068_s12, %s1264_s12   ;;  %s1034_s11 = sphi %s1066_s11, %s1263_s11   ;;  %s1030_s10 = sphi %s1064_s10, %s1262_s10   ;;  %s1026_s9 = sphi %s1062_s9, %s1261_s9  }
   0x4   : > { %s1087_s15 = sadd.s32 1, %s1038_s12   ;;  %s74_s16 = sadd.s32 1, %s1034_s11 }
   0x5   : > { %s71_s17 = ssub.s32 %s1038_s12, %s1087_s15  ;;  %p84_p0 = scmp.ne.s32.totalorder %s1034_s11, %s1030_s10 }
   0x6   : > { %p72_p1 = scmp.eq.s32.totalorder %s71_s17, 0  ;;  %p85_p2 = scmp.eq.s32.totalorder %s1083_s13, 1 }
   0x7   : > { %p90_p3 = scmp.ne.s32.totalorder %s1030_s10, %s1026_s9  ;;  %p91_p4 = scmp.eq.s32.totalorder %s828_s14, 1 }
   0x8   : > { %s1098_s18 = scalar_select %p72_p1, %s1034_s11, %s74_s16  }
   0x9   : > { %p1100_p5 = por %p85_p2, %p84_p0  ;;  %p1104_p6 = por %p91_p4, %p90_p3 }
   0xa   : > { %p831_p7 = scmp.ge.s32.totalorder %s1038_s12, 1  ;;  %p125_p8 = scmp.lt.s32.totalorder %s1038_s12, 3 }
   0xc   : > { %p126_p9 = pnand %p831_p7, %p125_p8 }
   0xd   : > { %p152_p10 = scmp.lt.s32.totalorder (!%p126_p9), %s1083_s13, 1  ;;  %s1041_s30 = smov (!%p126_p9), 68  }
   0xe   : > { %129 = sbr.rel (%p126_p9) target bundleno = 4189 (0x105d), region = 28  ;;  %s1042_s3 = smov (!%p126_p9), 20  }
   0xf   : > { %s1043_s4 = smov (!%p126_p9), 88   ;;  %s1044_s5 = smov (!%p126_p9), 108  }
  0x10   : > { %s149_s6 = sand.u32 (!%p126_p9), 1, %s1030_s10   ;;  %s873_s14 = smul.u32 (!%p126_p9), 14, %s1083_s13 }
  0x11   : > { %s870_s7 = smul.u32 (!%p126_p9), 14, %s149_s6  ;;  %s739_s24 = scalar_lea.sflag (!%p126_p9), [#allocation5], %s149_s6 }
  0x12   : > { %s996_s28 = scalar_lea.hbm (!%p126_p9), %s1258_s2, 28 }
  0x13   : > { %vm162_vm0 = vcmask 156672   ;;  %v1040_v0 = vmov 0.0   ;;  %s1113_s21 = scalar_select %p152_p10, %s1083_s13, 1  ;;  %vm174_vm1 = vcmask 1043456   ;;  %vm170_vm2 = vcmask 162816  }
  0x14   : > { %163 = vst.msk [vmem:[#allocation2] sm:$0x3] %vm162_vm0, %v1040_v0  ;;  %s1145_s8 = scalar_lea.vmem [#allocation4], %s870_s7 }
  0x15   : > { %164 = vst.msk [vmem:[#allocation3] sm:$0x3] %vm162_vm0, %v1040_v0  ;;  %s872_s22 = smul.u32 24, %s1113_s21 }
  0x16   : > { %s871_s26 = smul.u32 14, %s1113_s21  ;;  %s750_s21 = scalar_lea.hbm %s1258_s2, %s873_s14 }
  0x17   : > { %s161_s25 = scalar_lea.vmem %s1257_s1, %s872_s22  ;;  %s751_s22 = sshll.u32 %s1145_s8, 4  ;;  %s752_s22 = int_to_ptr.vmem [resolvable:$true] %s751_s22 }
  0x18   : > { %v167_v1 = vld [vmem:[%s161_s25 + $0x10] sm:$0xf]  ;;  %v166_v2 = vld [vmem:[%s161_s25 + $0x8] sm:$0xff]  ;;  %v165_v3 = vld [vmem:[%s161_s25] sm:$0xff]  ;;  %s1132_s29 = scalar_lea.vmem %s1256_s0, %s871_s26  ;;  %s753_s23 = sshll.u32 %s750_s21, 4  ;;  %s754_s23 = int_to_ptr.hbm [resolvable:$true] %s753_s23 }
  0x19   : > { %834 = vmatpush.msk.msra.mxu0 %vm174_vm1, %v167_v1  ;;  %838 = vmatpush.msk.msra.mxu1 %vm174_vm1, %v167_v1  ;;  %v168_v5 = vld [vmem:[%s1132_s29] sm:$0x3]  ;;  %v837_v36 = vld [vmem:[%s1132_s29 + $0x2] sm:$0x3]  ;;  %s990_s25 = sshra.s32 %s754_s23, 4  ;;  %s991_s25 = int_to_ptr.hbm [resolvable:$true] %s990_s25 }
  0x1a   : > { %843 = vmatpush.msk.msra.mxu2 %vm174_vm1, %v167_v1  ;;  %848 = vmatpush.msk.msra.mxu3 %vm174_vm1, %v167_v1  ;;  %s992_s26 = scalar_lea.hbm %s991_s25, 14  ;;  %p997_p0 = scmp.lt.s32.totalorder %s991_s25, %s1258_s2 }
  0x1b   : > { %192 = vmatpush.msra.mxu0 %v166_v2  ;;  %v169_v4 = vld [vmem:[#allocation2] sm:$0x3]  ;;  %272 = vmatpush.msra.mxu1 %v166_v2  ;;  %p993_p11 = scmp.ne.s32.totalorder %s991_s25, %s992_s26  ;;  %p998_p1 = scmp.lt.s32.totalorder %s996_s28, %s992_s26 }
  0x1c   : > { %353 = vmatpush.msra.mxu2 %v166_v2  ;;  %434 = vmatpush.msra.mxu3 %v166_v2  ;;  %v218_v9 = vld [vmem:[#allocation3] sm:$0x3] }
  0x1d   : > { %193 = vmatpush.msra.mxu0 %v165_v3  ;;  %273 = vmatpush.msra.mxu1 %v165_v3  ;;  %p994_p12 = pnand %p993_p11, %p1100_p5  ;;  %p999_p2 = por %p998_p1, %p997_p0 }
  0x1e   : > { %835 = vmatmul.msk.f32.vlgmr.msra.gmra.mxu0 %vm170_vm2, %v169_v4  ;;  %354 = vmatpush.msra.mxu2 %v165_v3 }
  0x1f   : > { %435 = vmatpush.msra.mxu3 %v165_v3  ;;  %853 = vmatpush.msk.msrb.mxu0 %vm174_vm1, %v167_v1  ;;  %p995_p13 = pneg %p994_p12 }
  0x20   : > { %858 = vmatpush.msk.msrb.mxu1 %vm174_vm1, %v167_v1  ;;  %863 = vmatpush.msk.msrb.mxu2 %vm174_vm1, %v167_v1 }
  0x21   : > { %515 = vmatpush.msrb.mxu0 %v166_v2  ;;  %p1000_p3 = pnand %p999_p2, %p995_p13 }
  0x22   : > { %596 = vmatpush.msrb.mxu1 %v166_v2  ;;  %677 = vmatpush.msrb.mxu2 %v166_v2  ;;  %v842_v2 = vld [vmem:[%s1132_s29 + $0x4] sm:$0x3] }
  0x23   : > { %516 = vmatpush.msrb.mxu0 %v165_v3 }
  0x24   : > { %597 = vmatpush.msrb.mxu1 %v165_v3  ;;  %678 = vmatpush.msrb.mxu2 %v165_v3 }
  0x9b   : > { %v195_v6 = vpop.f32.mrf.mxu0 }
  0x9c   : > { %v198_v7 = vadd.f32 %v195_v6, %v168_v5 }
  0x9e   : > { %920 = vtanh.f32 %v198_v7  ;;  %v836_v10 = vmul.f32 -1.442695, %v198_v7 }
  0xa0   : > { %922 = vpow2.f32 %v836_v10 }
  0xa4   : > { %v921_v8 = vpop.eup %920 }
  0xa5   : > { %226 = vrot.lane.b32.xlu0 %v921_v8, %s1041_s30 }
  0xa6   : > { %v923_v11 = vpop.eup %922 }
  0xa7   : > { %v202_v12 = vadd.f32 1.0, %v923_v11 }
  0xa9   : > { %924 = vrcp.f32 %v202_v12  ;;  %v214_v18 = vand.u32 2147483648, %v202_v12  ;;  %vm208_vm4 = vweird.f32 %v202_v12  ;;  %v212_v19 = vand.u32 2147483647, %v202_v12 }
  0xab   : > { %v215_v21 = vor.u32 1.1754944e-38, %v214_v18  ;;  %vm213_vm6 = vcmp.eq.f32.partialorder %v212_v19, 8.507059e+37 }
  0xad   : > { %220 = vrot.lane.b32.xlu0 %v218_v9, %s1042_s3 }
  0xaf   : > { %v925_v13 = vpop.eup %924 }
  0xb0   : > { %v204_v14 = vmul.f32 %v925_v13, %v202_v12  ;;  %vm209_vm3 = vweird.f32 %v925_v13 }
  0xb1   : > { %vm210_vm5 = vmor %vm208_vm4, %vm209_vm3 }
  0xb2   : > { %v205_v15 = vsub.f32 1.0, %v204_v14 }
  0xb4   : > { %v206_v16 = vmul.f32 %v925_v13, %v205_v15 }
  0xb6   : > { %v207_v17 = vadd.f32 %v925_v13, %v206_v16 }
  0xb8   : > { %v211_v20 = vsel %vm210_vm5, %v925_v13, %v207_v17 }
  0xb9   : > { %v216_v23 = vsel %vm213_vm6, %v215_v21, %v211_v20 }
 0x117   : > { %v227_v22 = vpop.permute.xlu0 %226 }
 0x118   : > { %v229_v24 = vmul.f32 %v227_v22, %v216_v23 }
 0x11a   : > { %231 = vrot.lane.b32.xlu1 %v229_v24, %s1042_s3 }
 0x11f   : > { %v221_v25 = vpop.permute.xlu0 %220 }
 0x120   : > { %v223_v26 = vmul.f32 %v221_v25, %v216_v23 }
 0x18c   : > { %v232_v27 = vpop.permute.xlu1 %231 }
 0x18d   : > { %v234_v28 = vadd.f32 %v232_v27, %v223_v26 }
 0x18f   : > { %926 = vtanh.f32 %v234_v28 }
 0x195   : > { %v927_v29 = vpop.eup %926 }
 0x196   : > { %237 = vrot.lane.b32.xlu1 %v927_v29, %s1042_s3 }
 0x208   : > { %v238_v30 = vpop.permute.xlu1 %237 }
 0x209   : > { %v240_v31 = vmul.f32 %v238_v30, %v216_v23 }
 0x20b   : > { %242 = vrot.lane.b32.xlu2 %v240_v31, %s1043_s4 }
 0x213   : > { %247 = vrot.lane.b32.xlu2 %v234_v28, %s1044_s5 }
 0x265   : > { %v243_v32 = vpop.permute.xlu2 %242 }
 0x266   : > { %245 = vst.msk [vmem:[#allocation2] sm:$0x3] %vm162_vm0, %v243_v32 }
 0x267   : > { %251 = vst.msk [vmem:[%s1145_s8] sm:$0x3] %vm162_vm0, %v243_v32  ;;  %v847_v32 = vld [vmem:[%s1132_s29 + $0x6] sm:$0x3] }
 0x26d   : > { %v248_v33 = vpop.permute.xlu2 %247  ;;  %v254_v34 = vld [vmem:[#allocation2] sm:$0x3] }
 0x26e   : > { %250 = vst.msk [vmem:[#allocation3] sm:$0x3] %vm162_vm0, %v248_v33  ;;  %839 = vmatmul.msk.f32.vlgmr.msra.gmra.mxu1 %vm170_vm2, %v254_v34 }
 0x275   : > { %v298_v35 = vld [vmem:[#allocation3] sm:$0x3] }
 0x276   : > { %300 = vrot.lane.b32.xlu1 %v298_v35, %s1042_s3 }
 0x2e8   : > { %v301_v55 = vpop.permute.xlu1 %300 }
 0x2eb   : > { %v275_v37 = vpop.f32.mrf.mxu1 }
 0x2ec   : > { %v278_v38 = vadd.f32 %v837_v36, %v275_v37 }
 0x2ee   : > { %928 = vtanh.f32 %v278_v38  ;;  %v840_v40 = vmul.f32 -1.442695, %v278_v38 }
 0x2f0   : > { %930 = vpow2.f32 %v840_v40 }
 0x2f4   : > { %v929_v39 = vpop.eup %928 }
 0x2f5   : > { %306 = vrot.lane.b32.xlu0 %v929_v39, %s1041_s30 }
 0x2f6   : > { %v931_v41 = vpop.eup %930 }
 0x2f7   : > { %v282_v42 = vadd.f32 1.0, %v931_v41 }
 0x2f9   : > { %932 = vrcp.f32 %v282_v42  ;;  %v294_v48 = vand.u32 2147483648, %v282_v42  ;;  %vm288_vm8 = vweird.f32 %v282_v42  ;;  %v292_v49 = vand.u32 2147483647, %v282_v42 }
 0x2fb   : > { %v295_v51 = vor.u32 1.1754944e-38, %v294_v48  ;;  %vm293_vm10 = vcmp.eq.f32.partialorder %v292_v49, 8.507059e+37 }
 0x2ff   : > { %v933_v43 = vpop.eup %932 }
 0x300   : > { %v284_v44 = vmul.f32 %v933_v43, %v282_v42  ;;  %vm289_vm7 = vweird.f32 %v933_v43 }
 0x301   : > { %vm290_vm9 = vmor %vm288_vm8, %vm289_vm7 }
 0x302   : > { %v285_v45 = vsub.f32 1.0, %v284_v44 }
 0x304   : > { %v286_v46 = vmul.f32 %v933_v43, %v285_v45 }
 0x306   : > { %v287_v47 = vadd.f32 %v933_v43, %v286_v46 }
 0x308   : > { %v291_v50 = vsel %vm290_vm9, %v933_v43, %v287_v47 }
 0x309   : > { %v296_v53 = vsel %vm293_vm10, %v295_v51, %v291_v50 }
 0x30a   : > { %v303_v56 = vmul.f32 %v301_v55, %v296_v53 }
 0x367   : > { %v307_v52 = vpop.permute.xlu0 %306 }
 0x368   : > { %v309_v54 = vmul.f32 %v307_v52, %v296_v53 }
 0x36a   : > { %311 = vrot.lane.b32.xlu2 %v309_v54, %s1042_s3 }
 0x3c4   : > { %v312_v57 = vpop.permute.xlu2 %311 }
 0x3c5   : > { %v314_v58 = vadd.f32 %v312_v57, %v303_v56 }
 0x3c7   : > { %934 = vtanh.f32 %v314_v58  ;;  %327 = vrot.lane.b32.xlu2 %v314_v58, %s1044_s5 }
 0x3cd   : > { %v935_v59 = vpop.eup %934 }
 0x3ce   : > { %317 = vrot.lane.b32.xlu0 %v935_v59, %s1042_s3 }
 0x421   : > { %v328_v60 = vpop.permute.xlu2 %327 }
 0x422   : > { %330 = vst.msk [vmem:[#allocation3] sm:$0x3] %vm162_vm0, %v328_v60 }
 0x429   : > { %v379_v63 = vld [vmem:[#allocation3] sm:$0x3] }
 0x440   : > { %v318_v61 = vpop.permute.xlu0 %317 }
 0x441   : > { %v320_v62 = vmul.f32 %v318_v61, %v296_v53 }
 0x443   : > { %322 = vrot.lane.b32.xlu1 %v320_v62, %s1043_s4  ;;  %v852_v62 = vld [vmem:[%s1132_s29 + $0x8] sm:$0x3] }
 0x44b   : > { %381 = vrot.lane.b32.xlu1 %v379_v63, %s1042_s3 }
 0x4b5   : > { %v323_v0 = vpop.permute.xlu1 %322 }
 0x4b6   : > { %325 = vst.msk [vmem:[#allocation2] sm:$0x3] %vm162_vm0, %v323_v0 }
 0x4b7   : > { %841 = vst.msk [vmem:[%s1145_s8 + $0x2] sm:$0x3] %vm162_vm0, %v323_v0 }
 0x4bd   : > { %v335_v1 = vld [vmem:[#allocation2] sm:$0x3]  ;;  %v382_v21 = vpop.permute.xlu1 %381 }
 0x4be   : > { %844 = vmatmul.msk.f32.vlgmr.msra.gmra.mxu2 %vm170_vm2, %v335_v1 }
 0x541   : > { %v356_v3 = vpop.f32.mrf.mxu2 }
 0x542   : > { %v359_v4 = vadd.f32 %v842_v2, %v356_v3 }
 0x544   : > { %936 = vtanh.f32 %v359_v4  ;;  %v845_v6 = vmul.f32 -1.442695, %v359_v4 }
 0x546   : > { %938 = vpow2.f32 %v845_v6 }
 0x54a   : > { %v937_v5 = vpop.eup %936 }
 0x54b   : > { %387 = vrot.lane.b32.xlu0 %v937_v5, %s1041_s30 }
 0x54c   : > { %v939_v7 = vpop.eup %938 }
 0x54d   : > { %v363_v8 = vadd.f32 1.0, %v939_v7 }
 0x54f   : > { %940 = vrcp.f32 %v363_v8  ;;  %v375_v14 = vand.u32 2147483648, %v363_v8  ;;  %vm369_vm12 = vweird.f32 %v363_v8  ;;  %v373_v15 = vand.u32 2147483647, %v363_v8 }
 0x551   : > { %v376_v17 = vor.u32 1.1754944e-38, %v375_v14  ;;  %vm374_vm14 = vcmp.eq.f32.partialorder %v373_v15, 8.507059e+37 }
 0x555   : > { %v941_v9 = vpop.eup %940 }
 0x556   : > { %v365_v10 = vmul.f32 %v941_v9, %v363_v8  ;;  %vm370_vm11 = vweird.f32 %v941_v9 }
 0x557   : > { %vm371_vm13 = vmor %vm369_vm12, %vm370_vm11 }
 0x558   : > { %v366_v11 = vsub.f32 1.0, %v365_v10 }
 0x55a   : > { %v367_v12 = vmul.f32 %v941_v9, %v366_v11 }
 0x55c   : > { %v368_v13 = vadd.f32 %v941_v9, %v367_v12 }
 0x55e   : > { %v372_v16 = vsel %vm371_vm13, %v941_v9, %v368_v13 }
 0x55f   : > { %v377_v19 = vsel %vm374_vm14, %v376_v17, %v372_v16 }
 0x560   : > { %v384_v22 = vmul.f32 %v382_v21, %v377_v19 }
 0x5bd   : > { %v388_v18 = vpop.permute.xlu0 %387 }
 0x5be   : > { %v390_v20 = vmul.f32 %v388_v18, %v377_v19 }
 0x5c0   : > { %392 = vrot.lane.b32.xlu2 %v390_v20, %s1042_s3 }
 0x61a   : > { %v393_v23 = vpop.permute.xlu2 %392 }
 0x61b   : > { %v395_v24 = vadd.f32 %v393_v23, %v384_v22 }
 0x61d   : > { %942 = vtanh.f32 %v395_v24  ;;  %408 = vrot.lane.b32.xlu2 %v395_v24, %s1044_s5 }
 0x623   : > { %v943_v25 = vpop.eup %942 }
 0x624   : > { %398 = vrot.lane.b32.xlu0 %v943_v25, %s1042_s3 }
 0x677   : > { %v409_v26 = vpop.permute.xlu2 %408 }
 0x678   : > { %411 = vst.msk [vmem:[#allocation3] sm:$0x3] %vm162_vm0, %v409_v26 }
 0x67f   : > { %v460_v29 = vld [vmem:[#allocation3] sm:$0x3] }
 0x696   : > { %v399_v27 = vpop.permute.xlu0 %398 }
 0x697   : > { %v401_v28 = vmul.f32 %v399_v27, %v377_v19 }
 0x699   : > { %403 = vrot.lane.b32.xlu1 %v401_v28, %s1043_s4  ;;  %v857_v28 = vld [vmem:[%s1132_s29 + $0xa] sm:$0x3] }
 0x6a1   : > { %462 = vrot.lane.b32.xlu1 %v460_v29, %s1042_s3 }
 0x70b   : > { %v404_v30 = vpop.permute.xlu1 %403 }
 0x70c   : > { %406 = vst.msk [vmem:[#allocation2] sm:$0x3] %vm162_vm0, %v404_v30 }
 0x70d   : > { %846 = vst.msk [vmem:[%s1145_s8 + $0x4] sm:$0x3] %vm162_vm0, %v404_v30 }
 0x713   : > { %v416_v31 = vld [vmem:[#allocation2] sm:$0x3]  ;;  %v463_v51 = vpop.permute.xlu1 %462 }
 0x714   : > { %849 = vmatmul.msk.f32.vlgmr.msra.gmra.mxu3 %vm170_vm2, %v416_v31 }
 0x797   : > { %v437_v33 = vpop.f32.mrf.mxu3 }
 0x798   : > { %v440_v34 = vadd.f32 %v847_v32, %v437_v33 }
 0x79a   : > { %944 = vtanh.f32 %v440_v34  ;;  %v850_v36 = vmul.f32 -1.442695, %v440_v34 }
 0x79c   : > { %946 = vpow2.f32 %v850_v36 }
 0x7a0   : > { %v945_v35 = vpop.eup %944 }
 0x7a1   : > { %468 = vrot.lane.b32.xlu0 %v945_v35, %s1041_s30 }
 0x7a2   : > { %v947_v37 = vpop.eup %946 }
 0x7a3   : > { %v444_v38 = vadd.f32 1.0, %v947_v37 }
 0x7a5   : > { %948 = vrcp.f32 %v444_v38  ;;  %v456_v44 = vand.u32 2147483648, %v444_v38  ;;  %vm450_vm1 = vweird.f32 %v444_v38  ;;  %v454_v45 = vand.u32 2147483647, %v444_v38 }
 0x7a7   : > { %v457_v47 = vor.u32 1.1754944e-38, %v456_v44  ;;  %vm455_vm4 = vcmp.eq.f32.partialorder %v454_v45, 8.507059e+37 }
 0x7ab   : > { %v949_v39 = vpop.eup %948 }
 0x7ac   : > { %v446_v40 = vmul.f32 %v949_v39, %v444_v38  ;;  %vm451_vm15 = vweird.f32 %v949_v39 }
 0x7ad   : > { %vm452_vm3 = vmor %vm450_vm1, %vm451_vm15 }
 0x7ae   : > { %v447_v41 = vsub.f32 1.0, %v446_v40 }
 0x7b0   : > { %v448_v42 = vmul.f32 %v949_v39, %v447_v41 }
 0x7b2   : > { %v449_v43 = vadd.f32 %v949_v39, %v448_v42 }
 0x7b4   : > { %v453_v46 = vsel %vm452_vm3, %v949_v39, %v449_v43 }
 0x7b5   : > { %v458_v49 = vsel %vm455_vm4, %v457_v47, %v453_v46 }
 0x7b6   : > { %v465_v52 = vmul.f32 %v463_v51, %v458_v49 }
 0x813   : > { %v469_v48 = vpop.permute.xlu0 %468 }
 0x814   : > { %v471_v50 = vmul.f32 %v469_v48, %v458_v49 }
 0x816   : > { %473 = vrot.lane.b32.xlu2 %v471_v50, %s1042_s3 }
 0x870   : > { %v474_v53 = vpop.permute.xlu2 %473 }
 0x871   : > { %v476_v54 = vadd.f32 %v474_v53, %v465_v52 }
 0x873   : > { %950 = vtanh.f32 %v476_v54  ;;  %489 = vrot.lane.b32.xlu2 %v476_v54, %s1044_s5 }
 0x879   : > { %v951_v55 = vpop.eup %950 }
 0x87a   : > { %479 = vrot.lane.b32.xlu0 %v951_v55, %s1042_s3 }
 0x8cd   : > { %v490_v56 = vpop.permute.xlu2 %489 }
 0x8ce   : > { %492 = vst.msk [vmem:[#allocation3] sm:$0x3] %vm162_vm0, %v490_v56 }
 0x8d5   : > { %v541_v59 = vld [vmem:[#allocation3] sm:$0x3] }
 0x8ec   : > { %v480_v57 = vpop.permute.xlu0 %479 }
 0x8ed   : > { %v482_v58 = vmul.f32 %v480_v57, %v458_v49 }
 0x8ef   : > { %484 = vrot.lane.b32.xlu1 %v482_v58, %s1043_s4  ;;  %v862_v58 = vld [vmem:[%s1132_s29 + $0xc] sm:$0x3] }
 0x8f7   : > { %543 = vrot.lane.b32.xlu1 %v541_v59, %s1042_s3 }
 0x961   : > { %v485_v60 = vpop.permute.xlu1 %484 }
 0x962   : > { %487 = vst.msk [vmem:[#allocation2] sm:$0x3] %vm162_vm0, %v485_v60 }
 0x963   : > { %851 = vst.msk [vmem:[%s1145_s8 + $0x6] sm:$0x3] %vm162_vm0, %v485_v60 }
 0x969   : > { %v497_v61 = vld [vmem:[#allocation2] sm:$0x3]  ;;  %v544_v17 = vpop.permute.xlu1 %543 }
 0x96a   : > { %854 = vmatmul.msk.f32.vlgmr.msrb.gmra.mxu0 %vm170_vm2, %v497_v61 }
 0x9e7   : > { %v518_v63 = vpop.f32.mrf.mxu0 }
 0x9e8   : > { %v521_v0 = vadd.f32 %v852_v62, %v518_v63 }
 0x9ea   : > { %952 = vtanh.f32 %v521_v0  ;;  %v855_v2 = vmul.f32 -1.442695, %v521_v0 }
 0x9ec   : > { %954 = vpow2.f32 %v855_v2 }
 0x9f0   : > { %v953_v1 = vpop.eup %952 }
 0x9f1   : > { %549 = vrot.lane.b32.xlu0 %v953_v1, %s1041_s30 }
 0x9f2   : > { %v955_v3 = vpop.eup %954 }
 0x9f3   : > { %v525_v4 = vadd.f32 1.0, %v955_v3 }
 0x9f5   : > { %956 = vrcp.f32 %v525_v4  ;;  %v537_v10 = vand.u32 2147483648, %v525_v4  ;;  %vm531_vm6 = vweird.f32 %v525_v4  ;;  %v535_v11 = vand.u32 2147483647, %v525_v4 }
 0x9f7   : > { %v538_v13 = vor.u32 1.1754944e-38, %v537_v10  ;;  %vm536_vm8 = vcmp.eq.f32.partialorder %v535_v11, 8.507059e+37 }
 0x9fb   : > { %v957_v5 = vpop.eup %956 }
 0x9fc   : > { %v527_v6 = vmul.f32 %v957_v5, %v525_v4  ;;  %vm532_vm5 = vweird.f32 %v957_v5 }
 0x9fd   : > { %vm533_vm7 = vmor %vm531_vm6, %vm532_vm5 }
 0x9fe   : > { %v528_v7 = vsub.f32 1.0, %v527_v6 }
 0xa00   : > { %v529_v8 = vmul.f32 %v957_v5, %v528_v7 }
 0xa02   : > { %v530_v9 = vadd.f32 %v957_v5, %v529_v8 }
 0xa04   : > { %v534_v12 = vsel %vm533_vm7, %v957_v5, %v530_v9 }
 0xa05   : > { %v539_v15 = vsel %vm536_vm8, %v538_v13, %v534_v12 }
 0xa06   : > { %v546_v18 = vmul.f32 %v544_v17, %v539_v15 }
 0xa63   : > { %v550_v14 = vpop.permute.xlu0 %549 }
 0xa64   : > { %v552_v16 = vmul.f32 %v550_v14, %v539_v15 }
 0xa66   : > { %554 = vrot.lane.b32.xlu2 %v552_v16, %s1042_s3 }
 0xac0   : > { %v555_v19 = vpop.permute.xlu2 %554 }
 0xac1   : > { %v557_v20 = vadd.f32 %v555_v19, %v546_v18 }
 0xac3   : > { %958 = vtanh.f32 %v557_v20  ;;  %570 = vrot.lane.b32.xlu2 %v557_v20, %s1044_s5 }
 0xac9   : > { %v959_v21 = vpop.eup %958 }
 0xaca   : > { %560 = vrot.lane.b32.xlu0 %v959_v21, %s1042_s3 }
 0xb1d   : > { %v571_v22 = vpop.permute.xlu2 %570 }
 0xb1e   : > { %573 = vst.msk [vmem:[#allocation3] sm:$0x3] %vm162_vm0, %v571_v22 }
 0xb25   : > { %v622_v25 = vld [vmem:[#allocation3] sm:$0x3] }
 0xb3c   : > { %v561_v23 = vpop.permute.xlu0 %560 }
 0xb3d   : > { %v563_v24 = vmul.f32 %v561_v23, %v539_v15 }
 0xb3f   : > { %565 = vrot.lane.b32.xlu1 %v563_v24, %s1043_s4 }
 0xb47   : > { %624 = vrot.lane.b32.xlu1 %v622_v25, %s1042_s3 }
 0xbb1   : > { %v566_v26 = vpop.permute.xlu1 %565 }
 0xbb2   : > { %568 = vst.msk [vmem:[#allocation2] sm:$0x3] %vm162_vm0, %v566_v26 }
 0xbb3   : > { %856 = vst.msk [vmem:[%s1145_s8 + $0x8] sm:$0x3] %vm162_vm0, %v566_v26 }
 0xbb9   : > { %v578_v27 = vld [vmem:[#allocation2] sm:$0x3]  ;;  %v625_v47 = vpop.permute.xlu1 %624 }
 0xbba   : > { %859 = vmatmul.msk.f32.vlgmr.msrb.gmra.mxu1 %vm170_vm2, %v578_v27 }
 0xc37   : > { %v599_v29 = vpop.f32.mrf.mxu1 }
 0xc38   : > { %v602_v30 = vadd.f32 %v857_v28, %v599_v29 }
 0xc3a   : > { %960 = vtanh.f32 %v602_v30  ;;  %v860_v32 = vmul.f32 -1.442695, %v602_v30 }
 0xc3c   : > { %962 = vpow2.f32 %v860_v32 }
 0xc40   : > { %v961_v31 = vpop.eup %960 }
 0xc41   : > { %630 = vrot.lane.b32.xlu0 %v961_v31, %s1041_s30 }
 0xc42   : > { %v963_v33 = vpop.eup %962 }
 0xc43   : > { %v606_v34 = vadd.f32 1.0, %v963_v33 }
 0xc45   : > { %964 = vrcp.f32 %v606_v34  ;;  %v618_v40 = vand.u32 2147483648, %v606_v34  ;;  %vm612_vm10 = vweird.f32 %v606_v34  ;;  %v616_v41 = vand.u32 2147483647, %v606_v34 }
 0xc47   : > { %v619_v43 = vor.u32 1.1754944e-38, %v618_v40  ;;  %vm617_vm12 = vcmp.eq.f32.partialorder %v616_v41, 8.507059e+37 }
 0xc4b   : > { %v965_v35 = vpop.eup %964 }
 0xc4c   : > { %v608_v36 = vmul.f32 %v965_v35, %v606_v34  ;;  %vm613_vm9 = vweird.f32 %v965_v35 }
 0xc4d   : > { %vm614_vm11 = vmor %vm612_vm10, %vm613_vm9 }
 0xc4e   : > { %v609_v37 = vsub.f32 1.0, %v608_v36 }
 0xc50   : > { %v610_v38 = vmul.f32 %v965_v35, %v609_v37 }
 0xc52   : > { %v611_v39 = vadd.f32 %v965_v35, %v610_v38 }
 0xc54   : > { %v615_v42 = vsel %vm614_vm11, %v965_v35, %v611_v39 }
 0xc55   : > { %v620_v45 = vsel %vm617_vm12, %v619_v43, %v615_v42 }
 0xc56   : > { %v627_v48 = vmul.f32 %v625_v47, %v620_v45 }
 0xcb3   : > { %v631_v44 = vpop.permute.xlu0 %630 }
 0xcb4   : > { %v633_v46 = vmul.f32 %v631_v44, %v620_v45 }
 0xcb6   : > { %635 = vrot.lane.b32.xlu2 %v633_v46, %s1042_s3 }
 0xd10   : > { %v636_v49 = vpop.permute.xlu2 %635 }
 0xd11   : > { %v638_v50 = vadd.f32 %v636_v49, %v627_v48 }
 0xd13   : > { %966 = vtanh.f32 %v638_v50  ;;  %651 = vrot.lane.b32.xlu2 %v638_v50, %s1044_s5 }
 0xd19   : > { %v967_v51 = vpop.eup %966 }
 0xd1a   : > { %641 = vrot.lane.b32.xlu0 %v967_v51, %s1042_s3 }
 0xd6d   : > { %v652_v52 = vpop.permute.xlu2 %651 }
 0xd6e   : > { %654 = vst.msk [vmem:[#allocation3] sm:$0x3] %vm162_vm0, %v652_v52 }
 0xd75   : > { %v703_v55 = vld [vmem:[#allocation3] sm:$0x3] }
 0xd8c   : > { %v642_v53 = vpop.permute.xlu0 %641 }
 0xd8d   : > { %v644_v54 = vmul.f32 %v642_v53, %v620_v45 }
 0xd8f   : > { %646 = vrot.lane.b32.xlu1 %v644_v54, %s1043_s4 }
 0xd97   : > { %705 = vrot.lane.b32.xlu1 %v703_v55, %s1042_s3 }
 0xe01   : > { %v647_v56 = vpop.permute.xlu1 %646 }
 0xe02   : > { %649 = vst.msk [vmem:[#allocation2] sm:$0x3] %vm162_vm0, %v647_v56 }
 0xe03   : > { %861 = vst.msk [vmem:[%s1145_s8 + $0xa] sm:$0x3] %vm162_vm0, %v647_v56 }
 0xe09   : > { %v659_v57 = vld [vmem:[#allocation2] sm:$0x3]  ;;  %v706_v13 = vpop.permute.xlu1 %705 }
 0xe0a   : > { %864 = vmatmul.msk.f32.vlgmr.msrb.gmra.mxu2 %vm170_vm2, %v659_v57 }
 0xe8d   : > { %v680_v59 = vpop.f32.mrf.mxu2 }
 0xe8e   : > { %v683_v60 = vadd.f32 %v862_v58, %v680_v59 }
 0xe90   : > { %968 = vtanh.f32 %v683_v60  ;;  %v865_v62 = vmul.f32 -1.442695, %v683_v60 }
 0xe92   : > { %970 = vpow2.f32 %v865_v62 }
 0xe96   : > { %v969_v61 = vpop.eup %968 }
 0xe97   : > { %711 = vrot.lane.b32.xlu0 %v969_v61, %s1041_s30 }
 0xe98   : > { %v971_v63 = vpop.eup %970 }
 0xe99   : > { %v687_v0 = vadd.f32 1.0, %v971_v63 }
 0xe9b   : > { %972 = vrcp.f32 %v687_v0  ;;  %v699_v6 = vand.u32 2147483648, %v687_v0  ;;  %vm693_vm2 = vweird.f32 %v687_v0  ;;  %v697_v7 = vand.u32 2147483647, %v687_v0 }
 0xe9d   : > { %v700_v9 = vor.u32 1.1754944e-38, %v699_v6  ;;  %vm698_vm15 = vcmp.eq.f32.partialorder %v697_v7, 8.507059e+37 }
 0xea1   : > { %v973_v1 = vpop.eup %972 }
 0xea2   : > { %v689_v2 = vmul.f32 %v973_v1, %v687_v0  ;;  %vm694_vm13 = vweird.f32 %v973_v1 }
 0xea3   : > { %vm695_vm14 = vmor %vm693_vm2, %vm694_vm13 }
 0xea4   : > { %v690_v3 = vsub.f32 1.0, %v689_v2 }
 0xea6   : > { %v691_v4 = vmul.f32 %v973_v1, %v690_v3 }
 0xea8   : > { %v692_v5 = vadd.f32 %v973_v1, %v691_v4 }
 0xeaa   : > { %v696_v8 = vsel %vm695_vm14, %v973_v1, %v692_v5 }
 0xeab   : > { %v701_v11 = vsel %vm698_vm15, %v700_v9, %v696_v8 }
 0xeac   : > { %v708_v14 = vmul.f32 %v706_v13, %v701_v11 }
 0xf09   : > { %v712_v10 = vpop.permute.xlu0 %711 }
 0xf0a   : > { %v714_v12 = vmul.f32 %v712_v10, %v701_v11 }
 0xf0c   : > { %716 = vrot.lane.b32.xlu2 %v714_v12, %s1042_s3 }
 0xf66   : > { %v717_v15 = vpop.permute.xlu2 %716 }
 0xf67   : > { %v719_v16 = vadd.f32 %v717_v15, %v708_v14 }
 0xf69   : > { %974 = vtanh.f32 %v719_v16  ;;  %732 = vrot.lane.b32.xlu2 %v719_v16, %s1044_s5 }
 0xf6f   : > { %v975_v17 = vpop.eup %974 }
 0xf70   : > { %722 = vrot.lane.b32.xlu0 %v975_v17, %s1042_s3 }
 0xfc3   : > { %v733_v18 = vpop.permute.xlu2 %732 }
 0xfc4   : > { %735 = vst.msk [vmem:[#allocation3] sm:$0x3] %vm162_vm0, %v733_v18 }
 0xfe2   : > { %v723_v19 = vpop.permute.xlu0 %722 }
 0xfe3   : > { %v725_v20 = vmul.f32 %v723_v19, %v701_v11 }
 0xfe5   : > { %727 = vrot.lane.b32.xlu1 %v725_v20, %s1043_s4 }
0x1057   : > { %v728_v21 = vpop.permute.xlu1 %727 }
0x1058   : > { %730 = vst.msk [vmem:[#allocation2] sm:$0x3] %vm162_vm0, %v728_v21 }
0x1059   : > { %866 = vst.msk [vmem:[%s1145_s8 + $0xc] sm:$0x3] %vm162_vm0, %v728_v21 }
0x105a   : > { %1003 = shalt.err (!%p1000_p3)
}
0x105b   : > { %s1045_s3 = smov 32   ;;  %s1046_s4 = smov 2  }
0x105c   : > { %874 = dma.vmem_to_hbm [thread:$0]  (%p1100_p5), %s752_s22, 224, %s754_s23, %s739_s24, %s1045_s3, %s1045_s3, %s1046_s4  }
0x105d PF: > { %p880_p4 = scmp.ge.s32.totalorder %s1038_s12, 2  ;;  %s768_s5 = sand.u32 1, %s1026_s9  }
0x105e   : > { %s769_s6 = scalar_lea.sflag [#allocation5], %s768_s5 }
0x105f   : > { %p877_p7 = pnand %p880_p4, %p1104_p6 }
0x1061   : > { %p878_p8 = pneg %p877_p7 }
0x1063   : > { %1021 = dma.done.wait (%p878_p8), %s769_s6, 224  }
0x1064   : > { %1023 = vsyncadd (%p878_p8), %s769_s6, 4294967072  ;;  %p12_p9 = scmp.ge.s32.totalorder %s1087_s15, 4   ;;  %s1261_s9 = smov %s1030_s10 }
0x1065   : > { %s1262_s10 = smov %s1034_s11  ;;  %s1263_s11 = smov %s1098_s18 }
0x1066   : > { %s1264_s12 = smov %s1087_s15  ;;  %14 = sbr.rel (!%p12_p9) target bundleno = 3 (0x3), region = 78 }
0x106b   :  { %775 = vsyncpa [#allocation5], 1 }
0x106c   :  { %777 = vsyncpa [#allocation5 + $0x1], 1 }

</bundles_post_ra>
